<compile_context>
chip_gen: v7x
topology: tpu7x:2x2x1
jax: 0.10.0
libtpu: 0.0.40
codegen_flags: <defaults>
</compile_context>

<pallas_src>
import functools
from math import pi

import numpy as np
import jax
import jax.numpy as jnp
from jax.experimental import pallas as pl
from jax.experimental.pallas import tpu as pltpu

N_QUBITS = 4
N_LAYERS = 2
BATCH = 8
BATCH_TILE = 128          # batch elements per grid step (lane width)
DIM = 2 ** N_QUBITS


def make_design(n_qubits, n_layers):
    design = {"n_layers": n_layers, "change_qubit": None}
    for layer in range(n_layers):
        for j in range(n_qubits):
            design[f"rot{layer}{j}"] = "Rx" if (layer + j) % 2 == 0 else "Ry"
            gate = "IsingXX" if j % 2 == 0 else "IsingZZ"
            design[f"enta{layer}{j}"] = (gate, [j, (j + 1) % n_qubits])
    return design


# ---------------------------------------------------------------------------
# Pallas kernel: statevector evolution + PauliZ expectations.
# State layout: (D, B) with the basis index on sublanes and batch on lanes;
# the re/im halves are concatenated into a (2D, B) slab for the MXU dots.
# ---------------------------------------------------------------------------
def quantum_kernel(ang_ref, u_ref, out_ref, *, n_qubits, n_layers):
    D = 2 ** n_qubits
    B = ang_ref.shape[-1]
    f32 = jnp.float32

    # per-basis-state "bit q == 0" masks, generated in-kernel (no DMA).
    basis = jax.lax.broadcasted_iota(jnp.int32, (D, B), 0)
    bit0 = [((basis >> (n_qubits - 1 - q)) & 1) == 0 for q in range(n_qubits)]

    # Bulk encoding trig: 2 cos/sin passes over the whole pre-arranged angle
    # block, then the four fused coefficients of Rot(phi, theta, omega):
    #   A = c * exp(+i*sgn*alpha),  B = sgn * s * exp(-i*sgn*beta)
    ang = ang_ref[...]                        # (3, nq, B): [alpha, theta/2, beta]
    cos_all = jnp.cos(ang)
    sin_all = jnp.sin(ang)
    cca = cos_all[1] * cos_all[0]             # (nq, B)  cos(th/2)*cos(alpha)
    csa = cos_all[1] * sin_all[0]             #          cos(th/2)*sin(alpha)
    scb = sin_all[1] * cos_all[2]             #          sin(th/2)*cos(beta)
    ssb = sin_all[1] * sin_all[2]             #          sin(th/2)*sin(beta)

    def flip(v, q):
        # v -> v[i ^ (1 << (n_qubits-1-q))] along the basis (sublane) axis.
        m = 1 << (n_qubits - 1 - q)
        if 2 * m == D:                        # top wire: one roll, no select
            return pltpu.roll(v, m, axis=0)
        up = pltpu.roll(v, D - m, axis=0)     # up[i] = v[(i + m) % D]
        dn = pltpu.roll(v, m, axis=0)         # dn[i] = v[(i - m) % D]
        return jnp.where(bit0[q], up, dn)

    slab = None
    for layer in range(n_layers):
        if layer == 0:
            # Encoding applied to |0...0>: product state, no flips required.
            re = jnp.where(bit0[0], cca[0:1], scb[0:1])
            im = jnp.where(bit0[0], -csa[0:1], -ssb[0:1])
            for q in range(1, n_qubits):
                ar = jnp.where(bit0[q], cca[q:q + 1], scb[q:q + 1])
                ai = jnp.where(bit0[q], -csa[q:q + 1], -ssb[q:q + 1])
                re, im = re * ar - im * ai, re * ai + im * ar
        else:
            re = slab[:D]                     # static slice at row D: free
            im = slab[D:]
            for q in range(n_qubits):
                re_f = flip(re, q)
                im_f = flip(im, q)
                # hoist the (1,B) -> (D,B) broadcasts once per (layer, qubit)
                cca_b = jnp.broadcast_to(cca[q:q + 1], (D, B))
                ssb_b = jnp.broadcast_to(ssb[q:q + 1], (D, B))
                csa_b = jnp.broadcast_to(csa[q:q + 1], (D, B))
                scb_b = jnp.broadcast_to(scb[q:q + 1], (D, B))
                csa_s = jnp.where(bit0[q], -csa_b, csa_b)   # sgn * c*sin(alpha)
                scb_s = jnp.where(bit0[q], -scb_b, scb_b)   # sgn * s*cos(beta)
                re, im = (cca_b * re - csa_s * im + scb_s * re_f + ssb_b * im_f,
                          cca_b * im + csa_s * re + scb_s * im_f - ssb_b * re_f)

        # Trainable block: ONE real (2D,2D)@(2D,B) MXU dot on the [re; im] slab.
        slab = jnp.concatenate([re, im], axis=0)             # (2D, B)
        slab = jnp.dot(u_ref[layer], slab, preferred_element_type=f32)

    # <PauliZ(q)> = sum_i sign_q(i) * (re_i^2 + im_i^2)  ->  one MXU dot,
    # lands directly as the lane-dense (n_qubits, B) output tile.
    col = jax.lax.broadcasted_iota(jnp.int32, (1, 2 * D), 1) & (D - 1)
    zrows = [(1 - 2 * ((col >> (n_qubits - 1 - q)) & 1)).astype(f32)
             for q in range(n_qubits)]
    zmat = jnp.concatenate(zrows, axis=0)                    # (nq, 2D)
    out_ref[...] = jnp.dot(zmat, slab * slab, preferred_element_type=f32)


# ---------------------------------------------------------------------------
# Host-side: fold each layer's trainable gates into one real (2D,2D) block
# matrix [[Ur,-Ui],[Ui,Ur]] (MSB-first wire convention, same as the kernel).
# Traced under the caller's jax.jit, so it fuses with the forward path.
# ---------------------------------------------------------------------------
def build_layer_unitaries(rot_params, enta_params, design, n_qubits):
    n_layers = design["n_layers"]
    D = 2 ** n_qubits
    idx = jnp.arange(D, dtype=jnp.int32)
    rot_params = rot_params.astype(jnp.float32)
    enta_params = enta_params.astype(jnp.float32)

    def bitcol(w):
        return (((idx >> (n_qubits - 1 - w)) & 1).astype(jnp.float32))[:, None]

    mats = []
    for layer in range(n_layers):
        psi = jnp.eye(D, dtype=jnp.complex64)
        for j in range(n_qubits):
            theta = rot_params[j, layer]
            c = jnp.cos(0.5 * theta)
            s = jnp.sin(0.5 * theta)
            m = 1 << (n_qubits - 1 - j)
            flipped = psi[idx ^ m, :]
            if design[f"rot{layer}{j}"] == "Rx":
                psi = c * psi - 1j * s * flipped
            else:  # Ry
                sgn = 2.0 * bitcol(j) - 1.0
                psi = c * psi + (sgn * s) * flipped

            gate, (wa, wb) = design[f"enta{layer}{j}"]
            if wa != wb:
                te = enta_params[j, layer]
                if gate == "IsingXX":
                    mm = (1 << (n_qubits - 1 - wa)) | (1 << (n_qubits - 1 - wb))
                    psi = (jnp.cos(0.5 * te) * psi
                           - 1j * jnp.sin(0.5 * te) * psi[idx ^ mm, :])
                else:  # IsingZZ: pure phase exp(-i*te/2 * Z.Z)
                    ba = (idx >> (n_qubits - 1 - wa)) & 1
                    bb = (idx >> (n_qubits - 1 - wb)) & 1
                    zz = (1 - 2 * (ba ^ bb)).astype(jnp.float32)[:, None]
                    ang = -0.5 * te * zz
                    psi = psi * (jnp.cos(ang) + 1j * jnp.sin(ang))
        ur = jnp.real(psi).astype(jnp.float32)
        ui = jnp.imag(psi).astype(jnp.float32)
        w = jnp.concatenate([jnp.concatenate([ur, -ui], axis=1),
                             jnp.concatenate([ui, ur], axis=1)], axis=0)
        mats.append(w)
    return jnp.stack(mats)                                   # (n_layers, 2D, 2D)


# ---------------------------------------------------------------------------
# Wrapper: batch-on-lanes layout + pallas_call with a parallel batch grid.
# ---------------------------------------------------------------------------
def quantum_layer_forward(x, rot_params, enta_params, design, n_qubits,
                          batch_tile=BATCH_TILE):
    n_layers = design["n_layers"]
    B = x.shape[0]
    D = 2 ** n_qubits
    b_pad = ((B + batch_tile - 1) // batch_tile) * batch_tile

    # Pre-arrange the encoding angles as (3, n_qubits, B_pad):
    # [alpha=(phi+omega)/2, theta/2, beta=(phi-omega)/2], batch on lanes,
    # so the kernel can do bulk cos/sin.
    xt = jnp.transpose(x.astype(jnp.float32))                # (3*nq, B)
    phi, theta, omega = xt[0::3], xt[1::3], xt[2::3]          # (nq, B) each
    ang = jnp.stack([0.5 * (phi + omega), 0.5 * theta, 0.5 * (phi - omega)],
                    axis=0)                                   # (3, nq, B)
    ang_p = jnp.zeros((3, n_qubits, b_pad), jnp.float32).at[:, :, :B].set(ang)

    u = build_layer_unitaries(rot_params, enta_params, design, n_qubits)

    kernel = functools.partial(quantum_kernel, n_qubits=n_qubits,
                               n_layers=n_layers)
    out = pl.pallas_call(
        kernel,
        out_shape=jax.ShapeDtypeStruct((n_qubits, b_pad), jnp.float32),
        grid_spec=pltpu.PrefetchScalarGridSpec(
            num_scalar_prefetch=0,
            grid=(b_pad // batch_tile,),
            in_specs=[
                pl.BlockSpec((3, n_qubits, batch_tile), lambda b: (0, 0, b)),
                pl.BlockSpec((n_layers, 2 * D, 2 * D), lambda b: (0, 0, 0)),
            ],
            out_specs=pl.BlockSpec((n_qubits, batch_tile), lambda b: (0, b)),
        ),
        compiler_params=pltpu.CompilerParams(
            dimension_semantics=("parallel",)),
    )(ang_p, u)

    # drop padded batch columns, return (B, n_qubits) like the torch module.
    return jnp.transpose(out[:, :B])


# ---------------------------------------------------------------------------
# Independent numpy reference (complex128), for checking.
# ---------------------------------------------------------------------------
def reference_forward(x, rot_p, enta_p, design, n_qubits):
    n_layers = design["n_layers"]
    x = np.asarray(x, np.float64)
    rot_p = np.asarray(rot_p, np.float64)
    enta_p = np.asarray(enta_p, np.float64)
    B = x.shape[0]

    def RZ(p): return np.diag([np.exp(-1j * p / 2), np.exp(1j * p / 2)])
    def RY(t):
        c, s = np.cos(t / 2), np.sin(t / 2)
        return np.array([[c, -s], [s, c]], dtype=np.complex128)
    def RX(t):
        c, s = np.cos(t / 2), np.sin(t / 2)
        return np.array([[c, -1j * s], [-1j * s, c]])

    X = np.array([[0, 1], [1, 0]], dtype=np.complex128)
    def IsingXX(t):
        return np.cos(t / 2) * np.eye(4) - 1j * np.sin(t / 2) * np.kron(X, X)
    def IsingZZ(t):
        zzd = np.array([1, -1, -1, 1], dtype=np.float64)
        return np.diag(np.exp(-1j * t / 2 * zzd))

    def ap1(psi, U, q):
        psi = np.moveaxis(psi, q, 0)
        psi = np.tensordot(U, psi, axes=([1], [0]))
        return np.moveaxis(psi, 0, q)

    def ap2(psi, U, qa, qb):
        psi = np.moveaxis(psi, (qa, qb), (0, 1))
        shp = psi.shape
        psi = (U @ psi.reshape(4, -1)).reshape(shp)
        return np.moveaxis(psi, (0, 1), (qa, qb))

    out = np.zeros((B, n_qubits))
    for b in range(B):
        psi = np.zeros([2] * n_qubits, dtype=np.complex128)
        psi[(0,) * n_qubits] = 1.0
        for layer in range(n_layers):
            for q in range(n_qubits):
                psi = ap1(psi, RZ(x[b, 3 * q + 0]), q)
                psi = ap1(psi, RY(x[b, 3 * q + 1]), q)
                psi = ap1(psi, RZ(x[b, 3 * q + 2]), q)
            for j in range(n_qubits):
                t = rot_p[j, layer]
                psi = ap1(psi, RX(t) if design[f"rot{layer}{j}"] == "Rx" else RY(t), j)
                gate, (wa, wb) = design[f"enta{layer}{j}"]
                if wa != wb:
                    te = enta_p[j, layer]
                    psi = ap2(psi, IsingXX(te) if gate == "IsingXX" else IsingZZ(te), wa, wb)
        probs = np.abs(psi) ** 2
        for q in range(n_qubits):
            marg = probs.sum(axis=tuple(a for a in range(n_qubits) if a != q))
            out[b, q] = marg[0] - marg[1]
    return out


if __name__ == "__main__":
    design = make_design(N_QUBITS, N_LAYERS)

    key = jax.random.PRNGKey(0)
    kx, kr, ke = jax.random.split(key, 3)
    # deterministic init: pi * U(0,1), matching nn.Parameter(pi * torch.rand(n_layers))
    x = jax.random.uniform(kx, (BATCH, 3 * N_QUBITS), dtype=jnp.float32) * pi
    q_params_rot = pi * jax.random.uniform(kr, (N_QUBITS, N_LAYERS), dtype=jnp.float32)
    q_params_enta = pi * jax.random.uniform(ke, (N_QUBITS, N_LAYERS), dtype=jnp.float32)

    # jit the whole path (unitary folding + pallas_call) as one XLA computation.
    fwd = jax.jit(functools.partial(quantum_layer_forward, design=design,
                                    n_qubits=N_QUBITS))
    out = jax.block_until_ready(fwd(x, q_params_rot, q_params_enta))

    ref = reference_forward(np.asarray(x), np.asarray(q_params_rot),
                            np.asarray(q_params_enta), design, N_QUBITS)
    np.testing.assert_allclose(np.asarray(out), ref, atol=1e-4, rtol=1e-4)
    print("KERNEL_OK")
</pallas_src>

<mosaic_0001>
module attributes {stable_mosaic.version = 11 : i64} {
  func.func @quantum_kernel(%arg0: i32, %arg1: memref<3x4x128xf32, #tpu.memory_space<vmem>>, %arg2: memref<2x32x32xf32, #tpu.memory_space<vmem>>, %arg3: memref<4x128xf32, #tpu.memory_space<vmem>>) attributes {dimension_semantics = [#tpu.dimension_semantics<parallel>], iteration_bounds = array<i64: 1>, scalar_prefetch = 0 : i64, scratch_operands = 0 : i64, tpu.core_type = #tpu.core_type<tc>, window_params = [{transform_indices = @transform_0, window_bounds = array<i64: 3, 4, 128>}, {pipeline_mode = #tpu.pipeline_mode<synchronous>, transform_indices = @transform_1, window_bounds = array<i64: 2, 32, 32>}, {transform_indices = @transform_2, window_bounds = array<i64: 4, 128>}]} {
    %0 = tpu.iota {dimensions = array<i32: 0>} : vector<16x128xi32>
    %c3_i32 = arith.constant 3 : i32
    %1 = vector.broadcast %c3_i32 : i32 to vector<16x128xi32>
    %2 = arith.shrsi %0, %1 : vector<16x128xi32>
    %c1_i32 = arith.constant 1 : i32
    %3 = vector.broadcast %c1_i32 : i32 to vector<16x128xi32>
    %4 = arith.andi %2, %3 : vector<16x128xi32>
    %c0_i32 = arith.constant 0 : i32
    %5 = vector.broadcast %c0_i32 : i32 to vector<16x128xi32>
    %6 = arith.cmpi eq, %4, %5 : vector<16x128xi32>
    %c2_i32 = arith.constant 2 : i32
    %7 = vector.broadcast %c2_i32 : i32 to vector<16x128xi32>
    %8 = arith.shrsi %0, %7 : vector<16x128xi32>
    %c1_i32_0 = arith.constant 1 : i32
    %9 = vector.broadcast %c1_i32_0 : i32 to vector<16x128xi32>
    %10 = arith.andi %8, %9 : vector<16x128xi32>
    %c0_i32_1 = arith.constant 0 : i32
    %11 = vector.broadcast %c0_i32_1 : i32 to vector<16x128xi32>
    %12 = arith.cmpi eq, %10, %11 : vector<16x128xi32>
    %c1_i32_2 = arith.constant 1 : i32
    %13 = vector.broadcast %c1_i32_2 : i32 to vector<16x128xi32>
    %14 = arith.shrsi %0, %13 : vector<16x128xi32>
    %c1_i32_3 = arith.constant 1 : i32
    %15 = vector.broadcast %c1_i32_3 : i32 to vector<16x128xi32>
    %16 = arith.andi %14, %15 : vector<16x128xi32>
    %c0_i32_4 = arith.constant 0 : i32
    %17 = vector.broadcast %c0_i32_4 : i32 to vector<16x128xi32>
    %18 = arith.cmpi eq, %16, %17 : vector<16x128xi32>
    %c0_i32_5 = arith.constant 0 : i32
    %19 = vector.broadcast %c0_i32_5 : i32 to vector<16x128xi32>
    %20 = arith.shrsi %0, %19 : vector<16x128xi32>
    %c1_i32_6 = arith.constant 1 : i32
    %21 = vector.broadcast %c1_i32_6 : i32 to vector<16x128xi32>
    %22 = arith.andi %20, %21 : vector<16x128xi32>
    %c0_i32_7 = arith.constant 0 : i32
    %23 = vector.broadcast %c0_i32_7 : i32 to vector<16x128xi32>
    %24 = arith.cmpi eq, %22, %23 : vector<16x128xi32>
    %c0 = arith.constant 0 : index
    %c0_8 = arith.constant 0 : index
    %c0_9 = arith.constant 0 : index
    %25 = vector.load %arg1[%c0, %c0_8, %c0_9] : memref<3x4x128xf32, #tpu.memory_space<vmem>>, vector<3x4x128xf32>
    %26 = math.cos %25 : vector<3x4x128xf32>
    %27 = math.sin %25 : vector<3x4x128xf32>
    %28 = vector.extract_strided_slice %26 {offsets = [1, 0, 0], sizes = [1, 4, 128], strides = [1, 1, 1]} : vector<3x4x128xf32> to vector<1x4x128xf32>
    %29 = vector.shape_cast %28 : vector<1x4x128xf32> to vector<4x128xf32>
    %30 = vector.extract_strided_slice %26 {offsets = [0, 0, 0], sizes = [1, 4, 128], strides = [1, 1, 1]} : vector<3x4x128xf32> to vector<1x4x128xf32>
    %31 = vector.shape_cast %30 : vector<1x4x128xf32> to vector<4x128xf32>
    %32 = arith.mulf %29, %31 : vector<4x128xf32>
    %33 = vector.extract_strided_slice %26 {offsets = [1, 0, 0], sizes = [1, 4, 128], strides = [1, 1, 1]} : vector<3x4x128xf32> to vector<1x4x128xf32>
    %34 = vector.shape_cast %33 : vector<1x4x128xf32> to vector<4x128xf32>
    %35 = vector.extract_strided_slice %27 {offsets = [0, 0, 0], sizes = [1, 4, 128], strides = [1, 1, 1]} : vector<3x4x128xf32> to vector<1x4x128xf32>
    %36 = vector.shape_cast %35 : vector<1x4x128xf32> to vector<4x128xf32>
    %37 = arith.mulf %34, %36 : vector<4x128xf32>
    %38 = vector.extract_strided_slice %27 {offsets = [1, 0, 0], sizes = [1, 4, 128], strides = [1, 1, 1]} : vector<3x4x128xf32> to vector<1x4x128xf32>
    %39 = vector.shape_cast %38 : vector<1x4x128xf32> to vector<4x128xf32>
    %40 = vector.extract_strided_slice %26 {offsets = [2, 0, 0], sizes = [1, 4, 128], strides = [1, 1, 1]} : vector<3x4x128xf32> to vector<1x4x128xf32>
    %41 = vector.shape_cast %40 : vector<1x4x128xf32> to vector<4x128xf32>
    %42 = arith.mulf %39, %41 : vector<4x128xf32>
    %43 = vector.extract_strided_slice %27 {offsets = [1, 0, 0], sizes = [1, 4, 128], strides = [1, 1, 1]} : vector<3x4x128xf32> to vector<1x4x128xf32>
    %44 = vector.shape_cast %43 : vector<1x4x128xf32> to vector<4x128xf32>
    %45 = vector.extract_strided_slice %27 {offsets = [2, 0, 0], sizes = [1, 4, 128], strides = [1, 1, 1]} : vector<3x4x128xf32> to vector<1x4x128xf32>
    %46 = vector.shape_cast %45 : vector<1x4x128xf32> to vector<4x128xf32>
    %47 = arith.mulf %44, %46 : vector<4x128xf32>
    %48 = vector.extract_strided_slice %32 {offsets = [0, 0], sizes = [1, 128], strides = [1, 1]} : vector<4x128xf32> to vector<1x128xf32>
    %49 = vector.extract_strided_slice %42 {offsets = [0, 0], sizes = [1, 128], strides = [1, 1]} : vector<4x128xf32> to vector<1x128xf32>
    %50 = vector.shape_cast %48 : vector<1x128xf32> to vector<1x128xf32>
    %51 = vector.broadcast %50 : vector<1x128xf32> to vector<16x128xf32>
    %52 = vector.shape_cast %49 : vector<1x128xf32> to vector<1x128xf32>
    %53 = vector.broadcast %52 : vector<1x128xf32> to vector<16x128xf32>
    %54 = arith.select %6, %51, %53 : vector<16x128xi1>, vector<16x128xf32>
    %55 = vector.extract_strided_slice %37 {offsets = [0, 0], sizes = [1, 128], strides = [1, 1]} : vector<4x128xf32> to vector<1x128xf32>
    %cst = arith.constant 0.000000e+00 : f32
    %56 = vector.broadcast %cst : f32 to vector<1x128xf32>
    %57 = arith.subf %56, %55 : vector<1x128xf32>
    %58 = vector.extract_strided_slice %47 {offsets = [0, 0], sizes = [1, 128], strides = [1, 1]} : vector<4x128xf32> to vector<1x128xf32>
    %cst_10 = arith.constant 0.000000e+00 : f32
    %59 = vector.broadcast %cst_10 : f32 to vector<1x128xf32>
    %60 = arith.subf %59, %58 : vector<1x128xf32>
    %61 = vector.shape_cast %57 : vector<1x128xf32> to vector<1x128xf32>
    %62 = vector.broadcast %61 : vector<1x128xf32> to vector<16x128xf32>
    %63 = vector.shape_cast %60 : vector<1x128xf32> to vector<1x128xf32>
    %64 = vector.broadcast %63 : vector<1x128xf32> to vector<16x128xf32>
    %65 = arith.select %6, %62, %64 : vector<16x128xi1>, vector<16x128xf32>
    %66 = vector.extract_strided_slice %32 {offsets = [1, 0], sizes = [1, 128], strides = [1, 1]} : vector<4x128xf32> to vector<1x128xf32>
    %67 = vector.extract_strided_slice %42 {offsets = [1, 0], sizes = [1, 128], strides = [1, 1]} : vector<4x128xf32> to vector<1x128xf32>
    %68 = vector.shape_cast %66 : vector<1x128xf32> to vector<1x128xf32>
    %69 = vector.broadcast %68 : vector<1x128xf32> to vector<16x128xf32>
    %70 = vector.shape_cast %67 : vector<1x128xf32> to vector<1x128xf32>
    %71 = vector.broadcast %70 : vector<1x128xf32> to vector<16x128xf32>
    %72 = arith.select %12, %69, %71 : vector<16x128xi1>, vector<16x128xf32>
    %73 = vector.extract_strided_slice %37 {offsets = [1, 0], sizes = [1, 128], strides = [1, 1]} : vector<4x128xf32> to vector<1x128xf32>
    %cst_11 = arith.constant 0.000000e+00 : f32
    %74 = vector.broadcast %cst_11 : f32 to vector<1x128xf32>
    %75 = arith.subf %74, %73 : vector<1x128xf32>
    %76 = vector.extract_strided_slice %47 {offsets = [1, 0], sizes = [1, 128], strides = [1, 1]} : vector<4x128xf32> to vector<1x128xf32>
    %cst_12 = arith.constant 0.000000e+00 : f32
    %77 = vector.broadcast %cst_12 : f32 to vector<1x128xf32>
    %78 = arith.subf %77, %76 : vector<1x128xf32>
    %79 = vector.shape_cast %75 : vector<1x128xf32> to vector<1x128xf32>
    %80 = vector.broadcast %79 : vector<1x128xf32> to vector<16x128xf32>
    %81 = vector.shape_cast %78 : vector<1x128xf32> to vector<1x128xf32>
    %82 = vector.broadcast %81 : vector<1x128xf32> to vector<16x128xf32>
    %83 = arith.select %12, %80, %82 : vector<16x128xi1>, vector<16x128xf32>
    %84 = arith.mulf %54, %72 : vector<16x128xf32>
    %85 = arith.mulf %65, %83 : vector<16x128xf32>
    %86 = arith.subf %84, %85 : vector<16x128xf32>
    %87 = arith.mulf %54, %83 : vector<16x128xf32>
    %88 = arith.mulf %65, %72 : vector<16x128xf32>
    %89 = arith.addf %87, %88 : vector<16x128xf32>
    %90 = vector.extract_strided_slice %32 {offsets = [2, 0], sizes = [1, 128], strides = [1, 1]} : vector<4x128xf32> to vector<1x128xf32>
    %91 = vector.extract_strided_slice %42 {offsets = [2, 0], sizes = [1, 128], strides = [1, 1]} : vector<4x128xf32> to vector<1x128xf32>
    %92 = vector.shape_cast %90 : vector<1x128xf32> to vector<1x128xf32>
    %93 = vector.broadcast %92 : vector<1x128xf32> to vector<16x128xf32>
    %94 = vector.shape_cast %91 : vector<1x128xf32> to vector<1x128xf32>
    %95 = vector.broadcast %94 : vector<1x128xf32> to vector<16x128xf32>
    %96 = arith.select %18, %93, %95 : vector<16x128xi1>, vector<16x128xf32>
    %97 = vector.extract_strided_slice %37 {offsets = [2, 0], sizes = [1, 128], strides = [1, 1]} : vector<4x128xf32> to vector<1x128xf32>
    %cst_13 = arith.constant 0.000000e+00 : f32
    %98 = vector.broadcast %cst_13 : f32 to vector<1x128xf32>
    %99 = arith.subf %98, %97 : vector<1x128xf32>
    %100 = vector.extract_strided_slice %47 {offsets = [2, 0], sizes = [1, 128], strides = [1, 1]} : vector<4x128xf32> to vector<1x128xf32>
    %cst_14 = arith.constant 0.000000e+00 : f32
    %101 = vector.broadcast %cst_14 : f32 to vector<1x128xf32>
    %102 = arith.subf %101, %100 : vector<1x128xf32>
    %103 = vector.shape_cast %99 : vector<1x128xf32> to vector<1x128xf32>
    %104 = vector.broadcast %103 : vector<1x128xf32> to vector<16x128xf32>
    %105 = vector.shape_cast %102 : vector<1x128xf32> to vector<1x128xf32>
    %106 = vector.broadcast %105 : vector<1x128xf32> to vector<16x128xf32>
    %107 = arith.select %18, %104, %106 : vector<16x128xi1>, vector<16x128xf32>
    %108 = arith.mulf %86, %96 : vector<16x128xf32>
    %109 = arith.mulf %89, %107 : vector<16x128xf32>
    %110 = arith.subf %108, %109 : vector<16x128xf32>
    %111 = arith.mulf %86, %107 : vector<16x128xf32>
    %112 = arith.mulf %89, %96 : vector<16x128xf32>
    %113 = arith.addf %111, %112 : vector<16x128xf32>
    %114 = vector.extract_strided_slice %32 {offsets = [3, 0], sizes = [1, 128], strides = [1, 1]} : vector<4x128xf32> to vector<1x128xf32>
    %115 = vector.extract_strided_slice %42 {offsets = [3, 0], sizes = [1, 128], strides = [1, 1]} : vector<4x128xf32> to vector<1x128xf32>
    %116 = vector.shape_cast %114 : vector<1x128xf32> to vector<1x128xf32>
    %117 = vector.broadcast %116 : vector<1x128xf32> to vector<16x128xf32>
    %118 = vector.shape_cast %115 : vector<1x128xf32> to vector<1x128xf32>
    %119 = vector.broadcast %118 : vector<1x128xf32> to vector<16x128xf32>
    %120 = arith.select %24, %117, %119 : vector<16x128xi1>, vector<16x128xf32>
    %121 = vector.extract_strided_slice %37 {offsets = [3, 0], sizes = [1, 128], strides = [1, 1]} : vector<4x128xf32> to vector<1x128xf32>
    %cst_15 = arith.constant 0.000000e+00 : f32
    %122 = vector.broadcast %cst_15 : f32 to vector<1x128xf32>
    %123 = arith.subf %122, %121 : vector<1x128xf32>
    %124 = vector.extract_strided_slice %47 {offsets = [3, 0], sizes = [1, 128], strides = [1, 1]} : vector<4x128xf32> to vector<1x128xf32>
    %cst_16 = arith.constant 0.000000e+00 : f32
    %125 = vector.broadcast %cst_16 : f32 to vector<1x128xf32>
    %126 = arith.subf %125, %124 : vector<1x128xf32>
    %127 = vector.shape_cast %123 : vector<1x128xf32> to vector<1x128xf32>
    %128 = vector.broadcast %127 : vector<1x128xf32> to vector<16x128xf32>
    %129 = vector.shape_cast %126 : vector<1x128xf32> to vector<1x128xf32>
    %130 = vector.broadcast %129 : vector<1x128xf32> to vector<16x128xf32>
    %131 = arith.select %24, %128, %130 : vector<16x128xi1>, vector<16x128xf32>
    %132 = arith.mulf %110, %120 : vector<16x128xf32>
    %133 = arith.mulf %113, %131 : vector<16x128xf32>
    %134 = arith.subf %132, %133 : vector<16x128xf32>
    %135 = arith.mulf %110, %131 : vector<16x128xf32>
    %136 = arith.mulf %113, %120 : vector<16x128xf32>
    %137 = arith.addf %135, %136 : vector<16x128xf32>
    %138 = tpu.concatenate %134, %137 in 0 : vector<16x128xf32>, vector<16x128xf32> -> vector<32x128xf32>
    %c0_17 = arith.constant 0 : index
    %c0_18 = arith.constant 0 : index
    %c0_19 = arith.constant 0 : index
    %139 = vector.load %arg2[%c0_17, %c0_18, %c0_19] : memref<2x32x32xf32, #tpu.memory_space<vmem>>, vector<1x32x32xf32>
    %140 = vector.shape_cast %139 : vector<1x32x32xf32> to vector<32x32xf32>
    %cst_20 = arith.constant dense<0.000000e+00> : vector<32x128xf32>
    %141 = tpu.matmul %140, %138, %cst_20 {dimension_numbers = #tpu.dot_dimension_numbers<[1], [0], [0], [1], [0, 0, 1, 1], [], []>} : vector<32x32xf32>, vector<32x128xf32>, vector<32x128xf32> -> vector<32x128xf32>
    %142 = vector.extract_strided_slice %141 {offsets = [0, 0], sizes = [16, 128], strides = [1, 1]} : vector<32x128xf32> to vector<16x128xf32>
    %143 = vector.extract_strided_slice %141 {offsets = [16, 0], sizes = [16, 128], strides = [1, 1]} : vector<32x128xf32> to vector<16x128xf32>
    %c8_i32 = arith.constant 8 : i32
    %144 = tpu.dynamic_rotate %142 by %c8_i32 dim 0 : vector<16x128xf32>, i32 -> vector<16x128xf32>
    %c8_i32_21 = arith.constant 8 : i32
    %145 = tpu.dynamic_rotate %143 by %c8_i32_21 dim 0 : vector<16x128xf32>, i32 -> vector<16x128xf32>
    %146 = vector.extract_strided_slice %32 {offsets = [0, 0], sizes = [1, 128], strides = [1, 1]} : vector<4x128xf32> to vector<1x128xf32>
    %147 = vector.shape_cast %146 : vector<1x128xf32> to vector<1x128xf32>
    %148 = vector.broadcast %147 : vector<1x128xf32> to vector<16x128xf32>
    %149 = vector.extract_strided_slice %47 {offsets = [0, 0], sizes = [1, 128], strides = [1, 1]} : vector<4x128xf32> to vector<1x128xf32>
    %150 = vector.shape_cast %149 : vector<1x128xf32> to vector<1x128xf32>
    %151 = vector.broadcast %150 : vector<1x128xf32> to vector<16x128xf32>
    %152 = vector.extract_strided_slice %37 {offsets = [0, 0], sizes = [1, 128], strides = [1, 1]} : vector<4x128xf32> to vector<1x128xf32>
    %153 = vector.shape_cast %152 : vector<1x128xf32> to vector<1x128xf32>
    %154 = vector.broadcast %153 : vector<1x128xf32> to vector<16x128xf32>
    %155 = vector.extract_strided_slice %42 {offsets = [0, 0], sizes = [1, 128], strides = [1, 1]} : vector<4x128xf32> to vector<1x128xf32>
    %156 = vector.shape_cast %155 : vector<1x128xf32> to vector<1x128xf32>
    %157 = vector.broadcast %156 : vector<1x128xf32> to vector<16x128xf32>
    %cst_22 = arith.constant 0.000000e+00 : f32
    %158 = vector.broadcast %cst_22 : f32 to vector<16x128xf32>
    %159 = arith.subf %158, %154 : vector<16x128xf32>
    %160 = arith.select %6, %159, %154 : vector<16x128xi1>, vector<16x128xf32>
    %cst_23 = arith.constant 0.000000e+00 : f32
    %161 = vector.broadcast %cst_23 : f32 to vector<16x128xf32>
    %162 = arith.subf %161, %157 : vector<16x128xf32>
    %163 = arith.select %6, %162, %157 : vector<16x128xi1>, vector<16x128xf32>
    %164 = arith.mulf %148, %142 : vector<16x128xf32>
    %165 = arith.mulf %160, %143 : vector<16x128xf32>
    %166 = arith.subf %164, %165 : vector<16x128xf32>
    %167 = arith.mulf %163, %144 : vector<16x128xf32>
    %168 = arith.addf %166, %167 : vector<16x128xf32>
    %169 = arith.mulf %151, %145 : vector<16x128xf32>
    %170 = arith.addf %168, %169 : vector<16x128xf32>
    %171 = arith.mulf %148, %143 : vector<16x128xf32>
    %172 = arith.mulf %160, %142 : vector<16x128xf32>
    %173 = arith.addf %171, %172 : vector<16x128xf32>
    %174 = arith.mulf %163, %145 : vector<16x128xf32>
    %175 = arith.addf %173, %174 : vector<16x128xf32>
    %176 = arith.mulf %151, %144 : vector<16x128xf32>
    %177 = arith.subf %175, %176 : vector<16x128xf32>
    %c12_i32 = arith.constant 12 : i32
    %178 = tpu.dynamic_rotate %170 by %c12_i32 dim 0 : vector<16x128xf32>, i32 -> vector<16x128xf32>
    %c4_i32 = arith.constant 4 : i32
    %179 = tpu.dynamic_rotate %170 by %c4_i32 dim 0 : vector<16x128xf32>, i32 -> vector<16x128xf32>
    %180 = arith.select %12, %178, %179 : vector<16x128xi1>, vector<16x128xf32>
    %c12_i32_24 = arith.constant 12 : i32
    %181 = tpu.dynamic_rotate %177 by %c12_i32_24 dim 0 : vector<16x128xf32>, i32 -> vector<16x128xf32>
    %c4_i32_25 = arith.constant 4 : i32
    %182 = tpu.dynamic_rotate %177 by %c4_i32_25 dim 0 : vector<16x128xf32>, i32 -> vector<16x128xf32>
    %183 = arith.select %12, %181, %182 : vector<16x128xi1>, vector<16x128xf32>
    %184 = vector.extract_strided_slice %32 {offsets = [1, 0], sizes = [1, 128], strides = [1, 1]} : vector<4x128xf32> to vector<1x128xf32>
    %185 = vector.shape_cast %184 : vector<1x128xf32> to vector<1x128xf32>
    %186 = vector.broadcast %185 : vector<1x128xf32> to vector<16x128xf32>
    %187 = vector.extract_strided_slice %47 {offsets = [1, 0], sizes = [1, 128], strides = [1, 1]} : vector<4x128xf32> to vector<1x128xf32>
    %188 = vector.shape_cast %187 : vector<1x128xf32> to vector<1x128xf32>
    %189 = vector.broadcast %188 : vector<1x128xf32> to vector<16x128xf32>
    %190 = vector.extract_strided_slice %37 {offsets = [1, 0], sizes = [1, 128], strides = [1, 1]} : vector<4x128xf32> to vector<1x128xf32>
    %191 = vector.shape_cast %190 : vector<1x128xf32> to vector<1x128xf32>
    %192 = vector.broadcast %191 : vector<1x128xf32> to vector<16x128xf32>
    %193 = vector.extract_strided_slice %42 {offsets = [1, 0], sizes = [1, 128], strides = [1, 1]} : vector<4x128xf32> to vector<1x128xf32>
    %194 = vector.shape_cast %193 : vector<1x128xf32> to vector<1x128xf32>
    %195 = vector.broadcast %194 : vector<1x128xf32> to vector<16x128xf32>
    %cst_26 = arith.constant 0.000000e+00 : f32
    %196 = vector.broadcast %cst_26 : f32 to vector<16x128xf32>
    %197 = arith.subf %196, %192 : vector<16x128xf32>
    %198 = arith.select %12, %197, %192 : vector<16x128xi1>, vector<16x128xf32>
    %cst_27 = arith.constant 0.000000e+00 : f32
    %199 = vector.broadcast %cst_27 : f32 to vector<16x128xf32>
    %200 = arith.subf %199, %195 : vector<16x128xf32>
    %201 = arith.select %12, %200, %195 : vector<16x128xi1>, vector<16x128xf32>
    %202 = arith.mulf %186, %170 : vector<16x128xf32>
    %203 = arith.mulf %198, %177 : vector<16x128xf32>
    %204 = arith.subf %202, %203 : vector<16x128xf32>
    %205 = arith.mulf %201, %180 : vector<16x128xf32>
    %206 = arith.addf %204, %205 : vector<16x128xf32>
    %207 = arith.mulf %189, %183 : vector<16x128xf32>
    %208 = arith.addf %206, %207 : vector<16x128xf32>
    %209 = arith.mulf %186, %177 : vector<16x128xf32>
    %210 = arith.mulf %198, %170 : vector<16x128xf32>
    %211 = arith.addf %209, %210 : vector<16x128xf32>
    %212 = arith.mulf %201, %183 : vector<16x128xf32>
    %213 = arith.addf %211, %212 : vector<16x128xf32>
    %214 = arith.mulf %189, %180 : vector<16x128xf32>
    %215 = arith.subf %213, %214 : vector<16x128xf32>
    %c14_i32 = arith.constant 14 : i32
    %216 = tpu.dynamic_rotate %208 by %c14_i32 dim 0 : vector<16x128xf32>, i32 -> vector<16x128xf32>
    %c2_i32_28 = arith.constant 2 : i32
    %217 = tpu.dynamic_rotate %208 by %c2_i32_28 dim 0 : vector<16x128xf32>, i32 -> vector<16x128xf32>
    %218 = arith.select %18, %216, %217 : vector<16x128xi1>, vector<16x128xf32>
    %c14_i32_29 = arith.constant 14 : i32
    %219 = tpu.dynamic_rotate %215 by %c14_i32_29 dim 0 : vector<16x128xf32>, i32 -> vector<16x128xf32>
    %c2_i32_30 = arith.constant 2 : i32
    %220 = tpu.dynamic_rotate %215 by %c2_i32_30 dim 0 : vector<16x128xf32>, i32 -> vector<16x128xf32>
    %221 = arith.select %18, %219, %220 : vector<16x128xi1>, vector<16x128xf32>
    %222 = vector.extract_strided_slice %32 {offsets = [2, 0], sizes = [1, 128], strides = [1, 1]} : vector<4x128xf32> to vector<1x128xf32>
    %223 = vector.shape_cast %222 : vector<1x128xf32> to vector<1x128xf32>
    %224 = vector.broadcast %223 : vector<1x128xf32> to vector<16x128xf32>
    %225 = vector.extract_strided_slice %47 {offsets = [2, 0], sizes = [1, 128], strides = [1, 1]} : vector<4x128xf32> to vector<1x128xf32>
    %226 = vector.shape_cast %225 : vector<1x128xf32> to vector<1x128xf32>
    %227 = vector.broadcast %226 : vector<1x128xf32> to vector<16x128xf32>
    %228 = vector.extract_strided_slice %37 {offsets = [2, 0], sizes = [1, 128], strides = [1, 1]} : vector<4x128xf32> to vector<1x128xf32>
    %229 = vector.shape_cast %228 : vector<1x128xf32> to vector<1x128xf32>
    %230 = vector.broadcast %229 : vector<1x128xf32> to vector<16x128xf32>
    %231 = vector.extract_strided_slice %42 {offsets = [2, 0], sizes = [1, 128], strides = [1, 1]} : vector<4x128xf32> to vector<1x128xf32>
    %232 = vector.shape_cast %231 : vector<1x128xf32> to vector<1x128xf32>
    %233 = vector.broadcast %232 : vector<1x128xf32> to vector<16x128xf32>
    %cst_31 = arith.constant 0.000000e+00 : f32
    %234 = vector.broadcast %cst_31 : f32 to vector<16x128xf32>
    %235 = arith.subf %234, %230 : vector<16x128xf32>
    %236 = arith.select %18, %235, %230 : vector<16x128xi1>, vector<16x128xf32>
    %cst_32 = arith.constant 0.000000e+00 : f32
    %237 = vector.broadcast %cst_32 : f32 to vector<16x128xf32>
    %238 = arith.subf %237, %233 : vector<16x128xf32>
    %239 = arith.select %18, %238, %233 : vector<16x128xi1>, vector<16x128xf32>
    %240 = arith.mulf %224, %208 : vector<16x128xf32>
    %241 = arith.mulf %236, %215 : vector<16x128xf32>
    %242 = arith.subf %240, %241 : vector<16x128xf32>
    %243 = arith.mulf %239, %218 : vector<16x128xf32>
    %244 = arith.addf %242, %243 : vector<16x128xf32>
    %245 = arith.mulf %227, %221 : vector<16x128xf32>
    %246 = arith.addf %244, %245 : vector<16x128xf32>
    %247 = arith.mulf %224, %215 : vector<16x128xf32>
    %248 = arith.mulf %236, %208 : vector<16x128xf32>
    %249 = arith.addf %247, %248 : vector<16x128xf32>
    %250 = arith.mulf %239, %221 : vector<16x128xf32>
    %251 = arith.addf %249, %250 : vector<16x128xf32>
    %252 = arith.mulf %227, %218 : vector<16x128xf32>
    %253 = arith.subf %251, %252 : vector<16x128xf32>
    %c15_i32 = arith.constant 15 : i32
    %254 = tpu.dynamic_rotate %246 by %c15_i32 dim 0 : vector<16x128xf32>, i32 -> vector<16x128xf32>
    %c1_i32_33 = arith.constant 1 : i32
    %255 = tpu.dynamic_rotate %246 by %c1_i32_33 dim 0 : vector<16x128xf32>, i32 -> vector<16x128xf32>
    %256 = arith.select %24, %254, %255 : vector<16x128xi1>, vector<16x128xf32>
    %c15_i32_34 = arith.constant 15 : i32
    %257 = tpu.dynamic_rotate %253 by %c15_i32_34 dim 0 : vector<16x128xf32>, i32 -> vector<16x128xf32>
    %c1_i32_35 = arith.constant 1 : i32
    %258 = tpu.dynamic_rotate %253 by %c1_i32_35 dim 0 : vector<16x128xf32>, i32 -> vector<16x128xf32>
    %259 = arith.select %24, %257, %258 : vector<16x128xi1>, vector<16x128xf32>
    %260 = vector.extract_strided_slice %32 {offsets = [3, 0], sizes = [1, 128], strides = [1, 1]} : vector<4x128xf32> to vector<1x128xf32>
    %261 = vector.shape_cast %260 : vector<1x128xf32> to vector<1x128xf32>
    %262 = vector.broadcast %261 : vector<1x128xf32> to vector<16x128xf32>
    %263 = vector.extract_strided_slice %47 {offsets = [3, 0], sizes = [1, 128], strides = [1, 1]} : vector<4x128xf32> to vector<1x128xf32>
    %264 = vector.shape_cast %263 : vector<1x128xf32> to vector<1x128xf32>
    %265 = vector.broadcast %264 : vector<1x128xf32> to vector<16x128xf32>
    %266 = vector.extract_strided_slice %37 {offsets = [3, 0], sizes = [1, 128], strides = [1, 1]} : vector<4x128xf32> to vector<1x128xf32>
    %267 = vector.shape_cast %266 : vector<1x128xf32> to vector<1x128xf32>
    %268 = vector.broadcast %267 : vector<1x128xf32> to vector<16x128xf32>
    %269 = vector.extract_strided_slice %42 {offsets = [3, 0], sizes = [1, 128], strides = [1, 1]} : vector<4x128xf32> to vector<1x128xf32>
    %270 = vector.shape_cast %269 : vector<1x128xf32> to vector<1x128xf32>
    %271 = vector.broadcast %270 : vector<1x128xf32> to vector<16x128xf32>
    %cst_36 = arith.constant 0.000000e+00 : f32
    %272 = vector.broadcast %cst_36 : f32 to vector<16x128xf32>
    %273 = arith.subf %272, %268 : vector<16x128xf32>
    %274 = arith.select %24, %273, %268 : vector<16x128xi1>, vector<16x128xf32>
    %cst_37 = arith.constant 0.000000e+00 : f32
    %275 = vector.broadcast %cst_37 : f32 to vector<16x128xf32>
    %276 = arith.subf %275, %271 : vector<16x128xf32>
    %277 = arith.select %24, %276, %271 : vector<16x128xi1>, vector<16x128xf32>
    %278 = arith.mulf %262, %246 : vector<16x128xf32>
    %279 = arith.mulf %274, %253 : vector<16x128xf32>
    %280 = arith.subf %278, %279 : vector<16x128xf32>
    %281 = arith.mulf %277, %256 : vector<16x128xf32>
    %282 = arith.addf %280, %281 : vector<16x128xf32>
    %283 = arith.mulf %265, %259 : vector<16x128xf32>
    %284 = arith.addf %282, %283 : vector<16x128xf32>
    %285 = arith.mulf %262, %253 : vector<16x128xf32>
    %286 = arith.mulf %274, %246 : vector<16x128xf32>
    %287 = arith.addf %285, %286 : vector<16x128xf32>
    %288 = arith.mulf %277, %259 : vector<16x128xf32>
    %289 = arith.addf %287, %288 : vector<16x128xf32>
    %290 = arith.mulf %265, %256 : vector<16x128xf32>
    %291 = arith.subf %289, %290 : vector<16x128xf32>
    %292 = tpu.concatenate %284, %291 in 0 : vector<16x128xf32>, vector<16x128xf32> -> vector<32x128xf32>
    %c1 = arith.constant 1 : index
    %c0_38 = arith.constant 0 : index
    %c0_39 = arith.constant 0 : index
    %293 = vector.load %arg2[%c1, %c0_38, %c0_39] : memref<2x32x32xf32, #tpu.memory_space<vmem>>, vector<1x32x32xf32>
    %294 = vector.shape_cast %293 : vector<1x32x32xf32> to vector<32x32xf32>
    %cst_40 = arith.constant dense<0.000000e+00> : vector<32x128xf32>
    %295 = tpu.matmul %294, %292, %cst_40 {dimension_numbers = #tpu.dot_dimension_numbers<[1], [0], [0], [1], [0, 0, 1, 1], [], []>} : vector<32x32xf32>, vector<32x128xf32>, vector<32x128xf32> -> vector<32x128xf32>
    %296 = tpu.iota {dimensions = array<i32: 1>} : vector<1x32xi32>
    %c15_i32_41 = arith.constant 15 : i32
    %297 = vector.broadcast %c15_i32_41 : i32 to vector<1x32xi32>
    %298 = arith.andi %296, %297 : vector<1x32xi32>
    %c3_i32_42 = arith.constant 3 : i32
    %299 = vector.broadcast %c3_i32_42 : i32 to vector<1x32xi32>
    %300 = arith.shrsi %298, %299 : vector<1x32xi32>
    %c1_i32_43 = arith.constant 1 : i32
    %301 = vector.broadcast %c1_i32_43 : i32 to vector<1x32xi32>
    %302 = arith.andi %300, %301 : vector<1x32xi32>
    %c2_i32_44 = arith.constant 2 : i32
    %303 = vector.broadcast %c2_i32_44 : i32 to vector<1x32xi32>
    %304 = arith.muli %303, %302 : vector<1x32xi32>
    %c1_i32_45 = arith.constant 1 : i32
    %305 = vector.broadcast %c1_i32_45 : i32 to vector<1x32xi32>
    %306 = arith.subi %305, %304 : vector<1x32xi32>
    %307 = arith.sitofp %306 : vector<1x32xi32> to vector<1x32xf32>
    %c2_i32_46 = arith.constant 2 : i32
    %308 = vector.broadcast %c2_i32_46 : i32 to vector<1x32xi32>
    %309 = arith.shrsi %298, %308 : vector<1x32xi32>
    %c1_i32_47 = arith.constant 1 : i32
    %310 = vector.broadcast %c1_i32_47 : i32 to vector<1x32xi32>
    %311 = arith.andi %309, %310 : vector<1x32xi32>
    %c2_i32_48 = arith.constant 2 : i32
    %312 = vector.broadcast %c2_i32_48 : i32 to vector<1x32xi32>
    %313 = arith.muli %312, %311 : vector<1x32xi32>
    %c1_i32_49 = arith.constant 1 : i32
    %314 = vector.broadcast %c1_i32_49 : i32 to vector<1x32xi32>
    %315 = arith.subi %314, %313 : vector<1x32xi32>
    %316 = arith.sitofp %315 : vector<1x32xi32> to vector<1x32xf32>
    %c1_i32_50 = arith.constant 1 : i32
    %317 = vector.broadcast %c1_i32_50 : i32 to vector<1x32xi32>
    %318 = arith.shrsi %298, %317 : vector<1x32xi32>
    %c1_i32_51 = arith.constant 1 : i32
    %319 = vector.broadcast %c1_i32_51 : i32 to vector<1x32xi32>
    %320 = arith.andi %318, %319 : vector<1x32xi32>
    %c2_i32_52 = arith.constant 2 : i32
    %321 = vector.broadcast %c2_i32_52 : i32 to vector<1x32xi32>
    %322 = arith.muli %321, %320 : vector<1x32xi32>
    %c1_i32_53 = arith.constant 1 : i32
    %323 = vector.broadcast %c1_i32_53 : i32 to vector<1x32xi32>
    %324 = arith.subi %323, %322 : vector<1x32xi32>
    %325 = arith.sitofp %324 : vector<1x32xi32> to vector<1x32xf32>
    %c0_i32_54 = arith.constant 0 : i32
    %326 = vector.broadcast %c0_i32_54 : i32 to vector<1x32xi32>
    %327 = arith.shrsi %298, %326 : vector<1x32xi32>
    %c1_i32_55 = arith.constant 1 : i32
    %328 = vector.broadcast %c1_i32_55 : i32 to vector<1x32xi32>
    %329 = arith.andi %327, %328 : vector<1x32xi32>
    %c2_i32_56 = arith.constant 2 : i32
    %330 = vector.broadcast %c2_i32_56 : i32 to vector<1x32xi32>
    %331 = arith.muli %330, %329 : vector<1x32xi32>
    %c1_i32_57 = arith.constant 1 : i32
    %332 = vector.broadcast %c1_i32_57 : i32 to vector<1x32xi32>
    %333 = arith.subi %332, %331 : vector<1x32xi32>
    %334 = arith.sitofp %333 : vector<1x32xi32> to vector<1x32xf32>
    %335 = tpu.concatenate %307, %316, %325, %334 in 0 : vector<1x32xf32>, vector<1x32xf32>, vector<1x32xf32>, vector<1x32xf32> -> vector<4x32xf32>
    %336 = arith.mulf %295, %295 : vector<32x128xf32>
    %cst_58 = arith.constant dense<0.000000e+00> : vector<4x128xf32>
    %337 = tpu.matmul %335, %336, %cst_58 {dimension_numbers = #tpu.dot_dimension_numbers<[1], [0], [0], [1], [0, 0, 1, 1], [], []>} : vector<4x32xf32>, vector<32x128xf32>, vector<4x128xf32> -> vector<4x128xf32>
    %c0_59 = arith.constant 0 : index
    %c0_60 = arith.constant 0 : index
    %338 = vector.load %arg3[%c0_59, %c0_60] : memref<4x128xf32, #tpu.memory_space<vmem>>, vector<4x128xf32>
    tpu.vector_store %arg3[%c0_59, %c0_60], %337 {strides = array<i32>} : memref<4x128xf32, #tpu.memory_space<vmem>>, vector<4x128xf32>,
    return
  }
  func.func @transform_0(%arg0: i32) -> (i32, i32, i32) {
    %c0_i32 = arith.constant 0 : i32
    %c0_i32_0 = arith.constant 0 : i32
    %c0_i32_1 = arith.constant 0 : i32
    return %c0_i32, %c0_i32_0, %arg0 : i32, i32, i32
  }
  func.func @transform_1(%arg0: i32) -> (i32, i32, i32) {
    %c0_i32 = arith.constant 0 : i32
    %c0_i32_0 = arith.constant 0 : i32
    %c0_i32_1 = arith.constant 0 : i32
    %c0_i32_2 = arith.constant 0 : i32
    return %c0_i32, %c0_i32_0, %c0_i32_1 : i32, i32, i32
  }
  func.func @transform_2(%arg0: i32) -> (i32, i32) {
    %c0_i32 = arith.constant 0 : i32
    %c0_i32_0 = arith.constant 0 : i32
    return %c0_i32, %arg0 : i32, i32
  }
}

</mosaic_0001>

<bundles_post_ra>
// kernel: quantum_layer_forward.1
= control target key start
LH: loop header
LB: loop body
LE: loop exit
PB: predicated region body
PF: predicated region fallthrough
CT: control target
= control target key end

     0   :  { %v1473_v21 = vmov 683565275   ;;  %v1474_v23 = vmov 2475754826   ;;  %v1475_v25 = vmov 2131351028   ;;  %s2074_s0 = inlined_call_operand.vmem [shape: f32[3,4,128], index: 0, kind: input, shape index: {}]   ;;  %s2075_s1 = inlined_call_operand.vmem [shape: f32[2,32,32], index: 1, kind: input, shape index: {}]   ;;  %s2076_s2 = inlined_call_operand.vmem [shape: f32[4,128], index: 2, kind: output, shape index: {}]  }
   0x1   :  { %v1500_v0 = vld [vmem:[%s2074_s0] sm:$0xf]  ;;  %v1507_v4 = vld [vmem:[%s2074_s0 + $0x4] sm:$0xf]  ;;  %v1515_v8 = vld [vmem:[%s2074_s0 + $0x8] sm:$0xf] }
   0x2   :  { %v42_v1 = vand.u32 2139095040, %v1500_v0  ;;  %v39_v2 = vand.u32 2147483647, %v1500_v0  ;;  %v142_v7 = vand.u32 2147483647, %v1507_v4  ;;  %v145_v10 = vand.u32 2139095040, %v1507_v4 }
   0x3   :  { %v248_v15 = vand.u32 2139095040, %v1515_v8  ;;  %v1476_v27 = vmov 2102212464   ;;  %v1477_v29 = vmov 920167782   ;;  %vm786_vm12 = vcmask 261120  }
   0x4   :  { %v43_v3 = vshrl.u32 %v42_v1, 23  ;;  %v46_v5 = vand.u32 8388607, %v39_v2  ;;  %v146_v12 = vshrl.u32 %v145_v10, 23  ;;  %v149_v14 = vand.u32 8388607, %v142_v7 }
   0x5   :  { %v249_v32 = vshrl.u32 %v248_v15, 23  ;;  %v1478_v38 = vmov 1326507024  }
   0x6   :  { %v1321_v6 = vadd.s32 4294967169, %v43_v3  ;;  %v47_v11 = vor.u32 8388608, %v46_v5  ;;  %v1325_v19 = vadd.s32 4294967169, %v146_v12  ;;  %v150_v31 = vor.u32 8388608, %v149_v14 }
   0x7   :  { %v1329_v56 = vadd.s32 4294967169, %v249_v32 }
   0x8   :  { %v49_v9 = vadd.s32 1, %v1321_v6  ;;  %v1521_v18 = vshll.u32 %v47_v11, 8  ;;  %v152_v43 = vadd.s32 1, %v1325_v19  ;;  %v1547_v6 = vshll.u32 %v150_v31, 8 }
   0x9   :  { %v255_v15 = vadd.s32 1, %v1329_v56 }
   0xa   :  { %vm50_vm0 = vcmp.gt.s32.totalorder %v49_v9, 0  ;;  %vm153_vm5 = vcmp.gt.s32.totalorder %v152_v43, 0 }
   0xb   :  { %v51_v13 = vsel %vm50_vm0, %v49_v9, 0  ;;  %v154_v55 = vsel %vm153_vm5, %v152_v43, 0  ;;  %vm256_vm11 = vcmp.gt.s32.totalorder %v255_v15, 0  ;;  %vm41_vm5 = vcmp.lt.s32.totalorder %v1500_v0, 0 }
   0xc   :  { %v53_v16 = vand.u32 31, %v51_v13  ;;  %v52_v17 = vshrl.u32 %v51_v13, 5  ;;  %v155_v60 = vshrl.u32 %v154_v55, 5  ;;  %v156_v3 = vand.u32 31, %v154_v55 }
   0xe   :  { %v54_v20 = vsub.s32 32, %v53_v16  ;;  %v56_v22 = vshll.u32 %v1473_v21, %v53_v16  ;;  %v59_v24 = vshll.u32 %v1474_v23, %v53_v16  ;;  %v62_v26 = vshll.u32 %v1475_v25, %v53_v16 }
   0xf   :  { %v65_v28 = vshll.u32 %v1476_v27, %v53_v16  ;;  %v68_v30 = vshll.u32 %v1477_v29, %v53_v16  ;;  %vm71_vm1 = vcmp.lt.s32.totalorder %v52_v17, 1  ;;  %vm74_vm2 = vcmp.lt.s32.totalorder %v52_v17, 4 }
  0x10   :  { %v55_v33 = vshrl.u32 %v1473_v21, %v54_v20  ;;  %v57_v34 = vshrl.u32 %v1474_v23, %v54_v20  ;;  %v60_v35 = vshrl.u32 %v1475_v25, %v54_v20  ;;  %v63_v36 = vshrl.u32 %v1476_v27, %v54_v20 }
  0x11   :  { %v66_v37 = vshrl.u32 %v1477_v29, %v54_v20  ;;  %v69_v39 = vshrl.u32 %v1478_v38, %v54_v20  ;;  %vm72_vm3 = vcmp.lt.s32.totalorder %v52_v17, 2  ;;  %vm73_vm4 = vcmp.lt.s32.totalorder %v52_v17, 3 }
  0x12   :  { %v58_v40 = vor.u32 %v57_v34, %v56_v22  ;;  %v61_v41 = vor.u32 %v60_v35, %v59_v24  ;;  %v64_v42 = vor.u32 %v63_v36, %v62_v26  ;;  %vm174_vm6 = vcmp.lt.s32.totalorder %v155_v60, 1 }
  0x13   :  { %v67_v44 = vor.u32 %v66_v37, %v65_v28  ;;  %v70_v45 = vor.u32 %v69_v39, %v68_v30  ;;  %vm177_vm7 = vcmp.lt.s32.totalorder %v155_v60, 4  ;;  %v157_v9 = vsub.s32 32, %v156_v3 }
  0x14   :  { %v75_v46 = vsel %vm71_vm1, %v55_v33, %v58_v40  ;;  %v76_v47 = vsel %vm74_vm2, %v64_v42, 2102212464  ;;  %v79_v48 = vsel %vm71_vm1, %v58_v40, %v61_v41  ;;  %v83_v49 = vsel %vm71_vm1, %v61_v41, %v64_v42 }
  0x15   :  { %v77_v50 = vsel %vm73_vm4, %v61_v41, %v76_v47  ;;  %v80_v51 = vsel %vm74_vm2, %v67_v44, 920167782  ;;  %v84_v52 = vsel %vm74_vm2, %v70_v45, 1326507024  ;;  %v159_v10 = vshll.u32 %v1473_v21, %v156_v3 }
  0x16   :  { %v81_v53 = vsel %vm73_vm4, %v64_v42, %v80_v51  ;;  %v85_v54 = vsel %vm73_vm4, %v67_v44, %v84_v52  ;;  %v78_v57 = vsel %vm72_vm3, %v75_v46, %v77_v50  ;;  %v162_v11 = vshll.u32 %v1474_v23, %v156_v3 }
  0x17   :  { %v82_v58 = vsel %vm72_vm3, %v79_v48, %v81_v53  ;;  %v86_v59 = vsel %vm72_vm3, %v83_v49, %v85_v54  ;;  %v94_v5 = vmul.u32 %v1521_v18, %v78_v57  ;;  %v165_v12 = vshll.u32 %v1475_v25, %v156_v3  ;;  %v782_v54 = vld [vmem:[%s2075_s1] sm:$0xff] }
  0x18   :  { %v1538_v61 = vmul.u32.u64.low %v1521_v18, %v86_v59  ;;  %v1539_v62 = vmul.u32.u64.high %v1521_v18, %v86_v59, %v1538_v61  ;;  %v1542_v63 = vmul.u32.u64.low %v1521_v18, %v82_v58  ;;  %v1543_v1 = vmul.u32.u64.high %v1521_v18, %v82_v58, %v1542_v63  ;;  %1387 = vmatprep.mubr.msk.f32.mxu0 %vm786_vm12, %v782_v54 }
  0x19   :  { %v168_v14 = vshll.u32 %v1476_v27, %v156_v3  ;;  %v158_v16 = vshrl.u32 %v1473_v21, %v157_v9  ;;  %v160_v17 = vshrl.u32 %v1474_v23, %v157_v9  ;;  %v163_v18 = vshrl.u32 %v1475_v25, %v157_v9 }
  0x1a   :  { %vm96_vm8 = vc.u32 %v1539_v62, %v1542_v63  ;;  %v97_v13 = vadd.s32 1, %v1543_v1  ;;  %v166_v19 = vshrl.u32 %v1476_v27, %v157_v9  ;;  %v169_v22 = vshrl.u32 %v1477_v29, %v157_v9 }
  0x1b   :  { %v171_v24 = vshll.u32 %v1477_v29, %v156_v3  ;;  %v172_v26 = vshrl.u32 %v1478_v38, %v157_v9  ;;  %v161_v30 = vor.u32 %v160_v17, %v159_v10  ;;  %v164_v31 = vor.u32 %v163_v18, %v162_v11 }
  0x1c   :  { %v98_v20 = vsel %vm96_vm8, %v97_v13, %v1543_v1  ;;  %v167_v32 = vor.u32 %v166_v19, %v165_v12  ;;  %v170_v33 = vor.u32 %v169_v22, %v168_v14  ;;  %vm175_vm9 = vcmp.lt.s32.totalorder %v155_v60, 2 }
  0x1d   :  { %v99_v28 = vadd.s32 %v98_v20, %v94_v5  ;;  %v173_v34 = vor.u32 %v172_v26, %v171_v24  ;;  %vm176_vm10 = vcmp.lt.s32.totalorder %v155_v60, 3  ;;  %v182_v37 = vsel %vm174_vm6, %v161_v30, %v164_v31 }
  0x1e   :  { %v179_v36 = vsel %vm177_vm7, %v167_v32, 2102212464  ;;  %v178_v39 = vsel %vm174_vm6, %v158_v16, %v161_v30  ;;  %v183_v40 = vsel %vm177_vm7, %v170_v33, 920167782  ;;  %v186_v41 = vsel %vm174_vm6, %v164_v31, %v167_v32 }
  0x1f   :  { %v100_v35 = vadd.s32 536870912, %v99_v28  ;;  %v187_v42 = vsel %vm177_vm7, %v173_v34, 1326507024  ;;  %v180_v44 = vsel %vm176_vm10, %v164_v31, %v179_v36  ;;  %v184_v45 = vsel %vm176_vm10, %v167_v32, %v183_v40 }
  0x20   :  { %v188_v46 = vsel %vm176_vm10, %v170_v33, %v187_v42  ;;  %v185_v47 = vsel %vm175_vm9, %v182_v37, %v184_v45  ;;  %v245_v49 = vand.u32 2147483647, %v1515_v8  ;;  %v257_v50 = vsel %vm256_vm11, %v255_v15, 0 }
  0x21   :  { %v1570_v43 = vshrl.u32 %v100_v35, 30  ;;  %v189_v48 = vsel %vm175_vm9, %v186_v41, %v188_v46  ;;  %v181_v55 = vsel %vm175_vm9, %v178_v39, %v180_v44  ;;  %v259_v58 = vand.u32 31, %v257_v50 }
  0x22   :  { %v1577_v52 = vmul.u32.u64.low %v1547_v6, %v189_v48  ;;  %v1578_v53 = vmul.u32.u64.high %v1547_v6, %v189_v48, %v1577_v52  ;;  %v1585_v56 = vmul.u32.u64.low %v1547_v6, %v185_v47  ;;  %v1586_v57 = vmul.u32.u64.high %v1547_v6, %v185_v47, %v1585_v56 }
  0x23   :  { %v102_v51 = vshll.u32 %v1570_v43, 30  ;;  %v252_v61 = vand.u32 8388607, %v245_v49  ;;  %v260_v1 = vsub.s32 32, %v259_v58  ;;  %v262_v3 = vshll.u32 %v1473_v21, %v259_v58 }
  0x24   :  { %v197_v5 = vmul.u32 %v1547_v6, %v181_v55  ;;  %vm199_vm13 = vc.u32 %v1578_v53, %v1585_v56  ;;  %v200_v9 = vadd.s32 1, %v1586_v57  ;;  %v265_v11 = vshll.u32 %v1474_v23, %v259_v58 }
  0x25   :  { %v1589_v59 = vsub.s32 %v99_v28, %v102_v51  ;;  %v263_v10 = vshrl.u32 %v1474_v23, %v260_v1  ;;  %v266_v12 = vshrl.u32 %v1475_v25, %v260_v1  ;;  %v258_v14 = vshrl.u32 %v257_v50, 5 }
  0x26   :  { %v201_v15 = vsel %vm199_vm13, %v200_v9, %v1586_v57  ;;  %v253_v16 = vor.u32 8388608, %v252_v61  ;;  %v268_v6 = vshll.u32 %v1475_v25, %v259_v58  ;;  %v269_v20 = vshrl.u32 %v1476_v27, %v260_v1 }
  0x27   :  { %v105_v60 = vsub.s32 0, %v1589_v59  ;;  %v264_v17 = vor.u32 %v263_v10, %v262_v3  ;;  %v202_v19 = vadd.s32 %v201_v15, %v197_v5  ;;  %v271_v22 = vshll.u32 %v1476_v27, %v259_v58 }
  0x28   :  { %v267_v24 = vor.u32 %v266_v12, %v265_v11  ;;  %v272_v23 = vshrl.u32 %v1477_v29, %v260_v1  ;;  %v274_v26 = vshll.u32 %v1477_v29, %v259_v58  ;;  %v275_v28 = vshrl.u32 %v1478_v38, %v260_v1 }
  0x29   :  { %v1322_v13 = vmin.u32 %v105_v60, %v1589_v59  ;;  %v203_v31 = vadd.s32 536870912, %v202_v19  ;;  %vm277_vm14 = vcmp.lt.s32.totalorder %v258_v14, 1  ;;  %v270_v32 = vor.u32 %v269_v20, %v268_v6 }
  0x2a   :  { %v273_v33 = vor.u32 %v272_v23, %v271_v22  ;;  %vm280_vm15 = vcmp.lt.s32.totalorder %v258_v14, 4  ;;  %v293_v25 = vshll.u32 %v253_v16, 8  ;;  %vm278_vm1 = vcmp.lt.s32.totalorder %v258_v14, 2 }
  0x2b   :  { %v107_v18 = vclz %v1322_v13  ;;  %v1611_v34 = vshrl.u32 %v203_v31, 30  ;;  %vm279_vm2 = vcmp.lt.s32.totalorder %v258_v14, 3  ;;  %v276_v35 = vor.u32 %v275_v28, %v274_v26 }
  0x2c   :  { %v285_v36 = vsel %vm277_vm14, %v264_v17, %v267_v24  ;;  %v286_v29 = vsel %vm280_vm15, %v273_v33, 920167782  ;;  %v95_v39 = vadd.s32 %v1542_v63, %v1539_v62  ;;  %v261_v40 = vshrl.u32 %v1473_v21, %v260_v1 }
  0x2d   :  { %v1323_v30 = vadd.s32 4294967294, %v107_v18  ;;  %v205_v38 = vshll.u32 %v1611_v34, 30  ;;  %v282_v41 = vsel %vm280_vm15, %v270_v32, 2102212464  ;;  %v287_v42 = vsel %vm279_vm2, %v270_v32, %v286_v29 }
  0x2e   :  { %v288_v46 = vsel %vm278_vm1, %v285_v36, %v287_v42  ;;  %v289_v47 = vsel %vm277_vm14, %v267_v24, %v270_v32  ;;  %v290_v50 = vsel %vm280_vm15, %v276_v35, 1326507024  ;;  %v281_v62 = vsel %vm277_vm14, %v261_v40, %v264_v17 }
  0x2f   :  { %vm1324_vm0 = vcmp.lt.s32.totalorder %v1323_v30, 0  ;;  %v206_v45 = vsub.s32 %v202_v19, %v205_v38  ;;  %v1624_v51 = vmul.u32.u64.low %v293_v25, %v288_v46  ;;  %v1625_v52 = vmul.u32.u64.high %v293_v25, %v288_v46, %v1624_v51 }
  0x30   :  { %v110_v27 = vsel %vm1324_vm0, 0, %v1323_v30  ;;  %v283_v21 = vsel %vm279_vm2, %v267_v24, %v282_v41  ;;  %v291_v63 = vsel %vm279_vm2, %v273_v33, %v290_v50  ;;  %v198_v16 = vadd.s32 %v1585_v56, %v1578_v53 }
  0x31   :  { %v115_v37 = vsub.s32 4294967266, %v110_v27  ;;  %v111_v44 = vsub.s32 32, %v110_v27  ;;  %v208_v54 = vsub.s32 0, %v206_v45  ;;  %v292_v57 = vsel %vm278_vm1, %v289_v47, %v291_v63 }
  0x32   :  { %v112_v58 = vshll.u32 %v1589_v59, %v110_v27  ;;  %v284_v60 = vsel %vm278_vm1, %v281_v62, %v283_v21  ;;  %v1633_v5 = vmul.u32.u64.low %v293_v25, %v292_v57  ;;  %v1634_v9 = vmul.u32.u64.high %v293_v25, %v292_v57, %v1633_v5 }
  0x33   :  { %v116_v48 = vadd.s32 127, %v115_v37  ;;  %v1326_v55 = vmin.u32 %v208_v54, %v206_v45  ;;  %v113_v61 = vshrl.u32 %v95_v39, %v111_v44  ;;  %v303_v10 = vadd.s32 1, %v1625_v52 }
  0x34   :  { %v300_v15 = vmul.u32 %v293_v25, %v284_v60  ;;  %vm302_vm4 = vc.u32 %v1634_v9, %v1624_v51  ;;  %vm144_vm6 = vcmp.lt.s32.totalorder %v1507_v4, 0  ;;  %vm1645_vm7 = vcmp.le.f32.partialorder %v39_v2, 0.7853982 }
  0x35   :  { %v117_v1 = vshll.u32 %v116_v48, 23  ;;  %v210_v3 = vclz %v1326_v55  ;;  %v114_v12 = vor.u32 %v113_v61, %v112_v58  ;;  %v304_v17 = vsel %vm302_vm4, %v303_v10, %v1625_v52 }
  0x36   :  { %v305_v22 = vadd.s32 %v304_v17, %v300_v15  ;;  %vm1653_vm8 = vcmp.le.f32.partialorder %v142_v7, 0.7853982  ;;  %v125_v46 = vsub.s32 4, %v1570_v43  ;;  %v301_v7 = vadd.s32 %v1624_v51, %v1634_v9 }
  0x37   :  { %v1327_v11 = vadd.s32 4294967294, %v210_v3  ;;  %v118_v13 = vor.u32 4788187, %v117_v1  ;;  %v121_v20 = vcvt.s32.f32 %v114_v12  ;;  %v228_v21 = vsub.s32 4, %v1611_v34 }
  0x38   :  { %v306_v26 = vadd.s32 536870912, %v305_v22  ;;  %v126_v62 = vsel %vm41_vm5, %v125_v46, %v1570_v43  ;;  %v11_v57 = vlaneseq  ;;  %vm247_vm10 = vcmp.lt.s32.totalorder %v1515_v8, 0 }
  0x39   :  { %vm1328_vm3 = vcmp.lt.s32.totalorder %v1327_v11, 0  ;;  %v119_v19 = vand.u32 2147483647, %v118_v13  ;;  %v128_v51 = vsel %vm1645_vm7, 0, %v126_v62  ;;  %v229_v1 = vsel %vm144_vm6, %v228_v21, %v1611_v34 }
  0x3a   :  { %v213_v59 = vsel %vm1328_vm3, 0, %v1327_v11  ;;  %v307_v32 = vshrl.u32 %v306_v26, 30  ;;  %v1677_v43 = vshrl.u32 %v11_v57, 7  ;;  %v441_v9 = vadd.s32 3, %v128_v51 }
  0x3b   :  { %v214_v14 = vsub.s32 32, %v213_v59  ;;  %v215_v6 = vshll.u32 %v206_v45, %v213_v59  ;;  %v218_v18 = vsub.s32 4294967266, %v213_v59  ;;  %v122_v31 = vmul.f32 %v121_v20, %v119_v19 }
  0x3c   :  { %v308_v33 = vshll.u32 %v307_v32, 30  ;;  %v331_v5 = vsub.s32 4, %v307_v32  ;;  %v231_v11 = vsel %vm1653_vm8, 0, %v229_v1  ;;  %v442_v19 = vand.u32 3, %v441_v9 }
  0x3d   :  { %v216_v24 = vshrl.u32 %v198_v16, %v214_v14  ;;  %v219_v23 = vadd.s32 127, %v218_v18  ;;  %v123_v27 = vxor.u32 2147483648, %v122_v31  ;;  %v235_v15 = vand.u32 3, %v231_v11 }
  0x3e   :  { %v309_v35 = vsub.s32 %v305_v22, %v308_v33  ;;  %v332_v34 = vsel %vm247_vm10, %v331_v5, %v307_v32  ;;  %v1685_v14 = vadd.s32 8, %v1677_v43  ;;  %v20_v18 = vshra.s32 %v1677_v43, 2 }
  0x3f   :  { %v217_v28 = vor.u32 %v216_v24, %v215_v6  ;;  %v220_v30 = vshll.u32 %v219_v23, 23  ;;  %v124_v39 = vsel %vm41_vm5, %v123_v27, %v122_v31  ;;  %v14_v6 = vshra.s32 %v1677_v43, 3 }
  0x40   :  { %v311_v29 = vsub.s32 0, %v309_v35  ;;  %v127_v2 = vsel %vm1645_vm7, %v1500_v0, %v124_v39  ;;  %v26_v20 = vshra.s32 %v1677_v43, 1  ;;  %v132_v22 = vand.u32 3, %v128_v51 }
  0x41   :  { %v221_v53 = vor.u32 4788187, %v220_v30  ;;  %v224_v56 = vcvt.s32.f32 %v217_v28  ;;  %1461 = vcosq.f32 %v127_v2  ;;  %vm246_vm11 = vcmp.le.f32.partialorder %v245_v49, 0.7853982 }
  0x42   :  { %v1330_v40 = vmin.u32 %v311_v29, %v309_v35  ;;  %1463 = vsinq.f32 %v127_v2  ;;  %vm131_vm13 = vweird.f32 %v1500_v0  ;;  %vm237_vm14 = vcmp.eq.s32.totalorder %v235_v15, 0 }
  0x43   :  { %v222_v25 = vand.u32 2147483647, %v221_v53  ;;  %v334_v26 = vsel %vm246_vm11, 0, %v332_v34  ;;  %v545_v28 = vadd.s32 3, %v231_v11  ;;  %vm240_vm15 = vcmp.eq.s32.totalorder %v235_v15, 2 }
  0x44   :  { %v313_v44 = vclz %v1330_v40  ;;  %vm444_vm0 = vcmp.eq.s32.totalorder %v442_v19, 0  ;;  %vm447_vm1 = vcmp.eq.s32.totalorder %v442_v19, 2  ;;  %vm134_vm2 = vcmp.eq.s32.totalorder %v132_v22, 0 }
  0x45   :  { %v225_v36 = vmul.f32 %v224_v56, %v222_v25  ;;  %vm137_vm3 = vcmp.eq.s32.totalorder %v132_v22, 2  ;;  %vm236_vm4 = vcmp.lt.s32.totalorder %v235_v15, 2  ;;  %vm443_vm5 = vcmp.lt.s32.totalorder %v442_v19, 2 }
  0x46   :  { %v1331_v45 = vadd.s32 4294967294, %v313_v44  ;;  %v546_v49 = vand.u32 3, %v545_v28  ;;  %v649_v33 = vadd.s32 3, %v334_v26  ;;  %v15_v29 = vshra.s32 %v1685_v14, 3 }
  0x47   :  { %v226_v37 = vxor.u32 2147483648, %v225_v36  ;;  %v27_v38 = vshra.s32 %v1685_v14, 1  ;;  %v32_v39 = vand.u32 1, %v1677_v43  ;;  %vm234_vm7 = vweird.f32 %v1507_v4 }
  0x48   :  { %vm1332_vm9 = vcmp.lt.s32.totalorder %v1331_v45, 0  ;;  %v1706_v2 = vand.u32 1, %v14_v6  ;;  %v338_v46 = vand.u32 3, %v334_v26  ;;  %v1740_v34 = vsub.s32 2, %v1677_v43 }
  0x49   :  { %v227_v42 = vsel %vm144_vm6, %v226_v37, %v225_v36  ;;  %v316_v48 = vsel %vm1332_vm9, 0, %v1331_v45  ;;  %v21_v37 = vshra.s32 %v1685_v14, 2  ;;  %vm133_vm6 = vcmp.lt.s32.totalorder %v132_v22, 2 }
  0x4a   :  { %v230_v47 = vsel %vm1653_vm8, %v1507_v4, %v227_v42  ;;  %v317_v50 = vsub.s32 32, %v316_v48  ;;  %v318_v52 = vshll.u32 %v309_v35, %v316_v48  ;;  %v321_v54 = vsub.s32 4294967266, %v316_v48 }
  0x4b   :  { %1465 = vcosq.f32 %v230_v47  ;;  %v1462_v10 = vpop.eup %1461  ;;  %vm548_vm8 = vcmp.eq.s32.totalorder %v546_v49, 0  ;;  %vm551_vm9 = vcmp.eq.s32.totalorder %v546_v49, 2  ;;  %v1708_v45 = vand.u32 1, %v20_v18 }
  0x4c   :  { %1467 = vsinq.f32 %v230_v47  ;;  %v319_v63 = vshrl.u32 %v301_v7, %v317_v50  ;;  %v322_v55 = vadd.s32 127, %v321_v54  ;;  %v1464_v13 = vpop.eup %1463  ;;  %v138_v23 = vxor.u32 2147483648, %v1462_v10 }
  0x4d   :  { %v135_v30 = vxor.u32 2147483648, %v1464_v13  ;;  %v650_v47 = vand.u32 3, %v649_v33  ;;  %v1710_v7 = vand.u32 1, %v26_v20  ;;  %v33_v48 = vand.u32 1, %v1685_v14 }
  0x4e   :  { %v320_v58 = vor.u32 %v319_v63, %v318_v52  ;;  %v323_v61 = vshll.u32 %v322_v55, 23  ;;  %v449_v36 = vsel %vm447_vm1, %v138_v23, %v1464_v13  ;;  %v139_v41 = vsel %vm137_vm3, %v138_v23, %v1464_v13 }
  0x4f   :  { %v446_v35 = vsel %vm444_vm0, %v1462_v10, %v135_v30  ;;  %v136_v40 = vsel %vm134_vm2, %v1462_v10, %v135_v30  ;;  %v1717_v63 = vand.u32 1, %v15_v29  ;;  %v1719_v55 = vand.u32 1, %v21_v37 }
  0x50   :  { %v324_v3 = vor.u32 4788187, %v323_v61  ;;  %v327_v60 = vcvt.s32.f32 %v320_v58  ;;  %v450_v44 = vsel %vm443_vm5, %v446_v35, %v449_v36  ;;  %v140_v50 = vsel %vm133_vm6, %v136_v40, %v139_v41 }
  0x51   :  { %v451_v54 = vsel %vm131_vm13, nan, %v450_v44  ;;  %v1721_v51 = vand.u32 1, %v27_v38  ;;  %v141_v61 = vsel %vm131_vm13, nan, %v140_v50  ;;  %vm343_vm0 = vcmp.eq.s32.totalorder %v338_v46, 2 }
  0x52   :  { %v325_v12 = vand.u32 2147483647, %v324_v3  ;;  %vm655_vm1 = vcmp.eq.s32.totalorder %v650_v47, 2  ;;  %vm652_vm2 = vcmp.eq.s32.totalorder %v650_v47, 0  ;;  %vm339_vm3 = vcmp.lt.s32.totalorder %v338_v46, 2 }
  0x53   :  { %v1731_v10 = vsub.s32 0, %v1677_v43  ;;  %v1734_v13 = vsub.s32 1, %v1677_v43  ;;  %vm24_vm13 = vcmp.eq.s32.totalorder %v1708_v45, 0  ;;  %vm30_vm5 = vcmp.eq.s32.totalorder %v1710_v7, 0 }
  0x54   :  { %v328_v59 = vmul.f32 %v327_v60, %v325_v12  ;;  %v1750_v4 = vsub.s32 3, %v1677_v43  ;;  %vm1752_vm6 = vcmp.eq.s32.totalorder %v32_v39, 0 }
  0x55   :  { %v1466_v16 = vpop.eup %1465 }
  0x56   :  { %v1468_v17 = vpop.eup %1467  ;;  %v329_v24 = vxor.u32 2147483648, %v328_v59  ;;  %v241_v32 = vxor.u32 2147483648, %v1466_v16 }
  0x57   :  { %v238_v31 = vxor.u32 2147483648, %v1468_v17 }
  0x58   :  { %v330_v53 = vsel %vm247_vm10, %v329_v24, %v328_v59  ;;  %v242_v27 = vsel %vm240_vm15, %v241_v32, %v1468_v17  ;;  %vm547_vm10 = vcmp.lt.s32.totalorder %v546_v49, 2  ;;  %v553_v21 = vsel %vm551_vm9, %v241_v32, %v1468_v17 }
  0x59   :  { %v333_v56 = vsel %vm246_vm11, %v1515_v8, %v330_v53  ;;  %v239_v25 = vsel %vm237_vm14, %v1466_v16, %v238_v31  ;;  %v550_v62 = vsel %vm548_vm8, %v1466_v16, %v238_v31  ;;  %vm337_vm11 = vweird.f32 %v1515_v8 }
  0x5a   :  { %1469 = vcosq.f32 %v333_v56  ;;  %v243_v42 = vsel %vm236_vm4, %v239_v25, %v242_v27  ;;  %vm18_vm14 = vcmp.eq.s32.totalorder %v1706_v2, 0  ;;  %vm340_vm15 = vcmp.eq.s32.totalorder %v338_v46, 0 }
  0x5b   :  { %1471 = vsinq.f32 %v333_v56  ;;  %v244_v52 = vsel %vm234_vm7, nan, %v243_v42  ;;  %v554_v60 = vsel %vm547_vm10, %v550_v62, %v553_v21  ;;  %vm651_vm4 = vcmp.lt.s32.totalorder %v650_v47, 2 }
  0x5c   :  { %v1728_v5 = vmul.f32 %v451_v54, %v244_v52  ;;  %v660_v0 = vmul.f32 %v244_v52, %v141_v61  ;;  %v555_v16 = vsel %vm234_vm7, nan, %v554_v60  ;;  %vm1756_vm7 = vcmp.eq.s32.totalorder %v33_v48, 0 }
  0x5d   :  { %vm19_vm8 = vcmp.eq.s32.totalorder %v1717_v63, 0  ;;  %vm25_vm9 = vcmp.eq.s32.totalorder %v1719_v55, 0  ;;  %vm31_vm10 = vcmp.eq.s32.totalorder %v1721_v51, 0 }
  0x5e   :  { %v674_v6 = vsub.f32 0.0, %v1728_v5  ;;  %v1763_v26 = vrot.slane %v660_v0, %v1731_v10  ;;  %v1766_v8 = vrot.slane %v660_v0, %v1734_v13  ;;  %v1772_v28 = vrot.slane %v660_v0, %v1740_v34 }
  0x5f   :  { %v1785_v33 = vrot.slane %v660_v0, %v1750_v4 }
  0x60   :  { %v679_v32 = vrot.slane %v674_v6, %v1731_v10  ;;  %v699_v56 = vrot.slane %v674_v6, %v1734_v13  ;;  %v731_v49 = vrot.slane %v674_v6, %v1740_v34  ;;  %v763_v25 = vrot.slane %v674_v6, %v1750_v4 }
  0x64   :  { %v1470_v58 = vpop.eup %1469 }
  0x65   :  { %v1472_v1 = vpop.eup %1471  ;;  %v344_v3 = vxor.u32 2147483648, %v1470_v58 }
  0x66   :  { %v341_v9 = vxor.u32 2147483648, %v1472_v1 }
  0x67   :  { %v345_v11 = vsel %vm343_vm0, %v344_v3, %v1472_v1  ;;  %v657_v12 = vsel %vm655_vm1, %v344_v3, %v1472_v1  ;;  %vm1047_vm0 = vcmp.lt.s32.totalorder %v1677_v43, 7  ;;  %vm1052_vm1 = vcmp.lt.s32.totalorder %v1677_v43, 1 }
  0x68   :  { %v342_v15 = vsel %vm340_vm15, %v1470_v58, %v341_v9  ;;  %v654_v59 = vsel %vm652_vm2, %v1470_v58, %v341_v9  ;;  %vm988_vm15 = vcmp.lt.s32.totalorder %v1677_v43, 2  ;;  %vm1480_vm2 = vmmov 0  }
  0x69   :  { %v346_v17 = vsel %vm339_vm3, %v342_v15, %v345_v11  ;;  %v658_v14 = vsel %vm651_vm4, %v654_v59, %v657_v12  ;;  %vm1233_vm3 = vcmask 1040384   ;;  %vm1235_vm4 = vcmask 1041408  }
  0x6a   :  { %v347_v18 = vsel %vm337_vm11, nan, %v346_v17  ;;  %v659_v19 = vsel %vm337_vm11, nan, %v658_v14  ;;  %vm928_vm11 = vcmp.lt.s32.totalorder %v1677_v43, 4 }
  0x6b   :  { %v662_v24 = vmul.f32 %v555_v16, %v347_v18  ;;  %v1760_v23 = vmul.f32 %v659_v19, %v555_v16 }
  0x6d   :  { %v1775_v30 = vrot.slane %v662_v24, %v1731_v10  ;;  %v675_v31 = vsub.f32 0.0, %v1760_v23  ;;  %v1780_v53 = vrot.slane %v662_v24, %v1734_v13  ;;  %v1807_v39 = vrot.slane %v662_v24, %v1740_v34 }
  0x6e   :  { %v1810_v40 = vrot.slane %v662_v24, %v1750_v4 }
  0x6f   :  { %v672_v27 = vsel %vm18_vm14, %v1763_v26, %v1775_v30  ;;  %v673_v35 = vsel %vm19_vm8, %v1763_v26, %v1775_v30  ;;  %v683_v36 = vrot.slane %v675_v31, %v1731_v10  ;;  %v694_v29 = vsel %vm24_vm13, %v1766_v8, %v1780_v53 }
  0x70   :  { %v695_v37 = vsel %vm25_vm9, %v1766_v8, %v1780_v53  ;;  %v703_v38 = vrot.slane %v675_v31, %v1734_v13  ;;  %v706_v44 = vmul.f32 %v694_v29, %v672_v27  ;;  %v726_v61 = vsel %vm30_vm5, %v1772_v28, %v1807_v39 }
  0x71   :  { %v684_v41 = vsel %vm18_vm14, %v679_v32, %v683_v36  ;;  %v685_v42 = vsel %vm19_vm8, %v679_v32, %v683_v36  ;;  %v707_v46 = vmul.f32 %v695_v37, %v673_v35  ;;  %v727_v1 = vsel %vm31_vm10, %v1772_v28, %v1807_v39 }
  0x72   :  { %v704_v47 = vsel %vm24_vm13, %v699_v56, %v703_v38  ;;  %v705_v48 = vsel %vm25_vm9, %v699_v56, %v703_v38  ;;  %v714_v50 = vmul.f32 %v694_v29, %v684_v41  ;;  %v715_v52 = vmul.f32 %v695_v37, %v685_v42 }
  0x73   :  { %v708_v54 = vmul.f32 %v704_v47, %v684_v41  ;;  %v709_v62 = vmul.f32 %v705_v48, %v685_v42  ;;  %v712_v21 = vmul.f32 %v704_v47, %v672_v27  ;;  %v713_v58 = vmul.f32 %v705_v48, %v673_v35 }
  0x74   :  { %v735_v3 = vrot.slane %v675_v31, %v1740_v34  ;;  %v767_v60 = vrot.slane %v675_v31, %v1750_v4  ;;  %v758_v59 = vsel %vm1752_vm6, %v1785_v33, %v1810_v40  ;;  %v759_v17 = vsel %vm1756_vm7, %v1785_v33, %v1810_v40 }
  0x75   :  { %v710_v9 = vsub.f32 %v706_v44, %v708_v54  ;;  %v711_v11 = vsub.f32 %v707_v46, %v709_v62  ;;  %v716_v12 = vadd.f32 %v714_v50, %v712_v21  ;;  %v717_v0 = vadd.f32 %v715_v52, %v713_v58 }
  0x76   :  { %v736_v15 = vsel %vm30_vm5, %v731_v49, %v735_v3  ;;  %v737_v16 = vsel %vm31_vm10, %v731_v49, %v735_v3  ;;  %v768_v35 = vsel %vm1752_vm6, %v763_v25, %v767_v60  ;;  %v769_v36 = vsel %vm1756_vm7, %v763_v25, %v767_v60  ;;  %v783_v25 = vld [vmem:[%s2075_s1 + $0x8] sm:$0xff]  ;;  %v785_v3 = vld [vmem:[%s2075_s1 + $0x18] sm:$0xff]  ;;  %v1349_v60 = vld [vmem:[%s2075_s1 + $0x20] sm:$0xff] }
  0x77   :  { %v738_v14 = vmul.f32 %v726_v61, %v710_v9  ;;  %v739_v6 = vmul.f32 %v727_v1, %v711_v11  ;;  %v740_v18 = vmul.f32 %v736_v15, %v716_v12  ;;  %v741_v19 = vmul.f32 %v737_v16, %v717_v0  ;;  %1401 = vmatprep.mubr.msk.f32.mxu1 %vm786_vm12, %v1349_v60 }
  0x78   :  { %v744_v24 = vmul.f32 %v736_v15, %v710_v9  ;;  %v745_v31 = vmul.f32 %v737_v16, %v711_v11  ;;  %v746_v32 = vmul.f32 %v726_v61, %v716_v12  ;;  %v747_v56 = vmul.f32 %v727_v1, %v717_v0  ;;  %v784_v1 = vld [vmem:[%s2075_s1 + $0x10] sm:$0xff] }
  0x79   :  { %v742_v27 = vsub.f32 %v738_v14, %v740_v18  ;;  %v743_v49 = vsub.f32 %v739_v6, %v741_v19  ;;  %v891_v9 = vrot.slane %v1728_v5, %v1731_v10  ;;  %v946_v11 = vrot.slane %v1728_v5, %v1734_v13 }
  0x7a   :  { %v748_v29 = vadd.f32 %v746_v32, %v744_v24  ;;  %v749_v37 = vadd.f32 %v747_v56, %v745_v31  ;;  %v1010_v12 = vrot.slane %v1728_v5, %v1740_v34  ;;  %v895_v15 = vsub.f32 0.0, %v1775_v30 }
  0x7b   :  { %v770_v38 = vmul.f32 %v758_v59, %v742_v27  ;;  %v771_v41 = vmul.f32 %v759_v17, %v743_v49  ;;  %v776_v42 = vmul.f32 %v768_v35, %v742_v27  ;;  %v777_v44 = vmul.f32 %v769_v36, %v743_v49 }
  0x7c   :  { %v772_v46 = vmul.f32 %v768_v35, %v748_v29  ;;  %v773_v47 = vmul.f32 %v769_v36, %v749_v37  ;;  %v778_v48 = vmul.f32 %v758_v59, %v748_v29  ;;  %v779_v50 = vmul.f32 %v759_v17, %v749_v37 }
  0x7d   :  { %v892_v0 = vsub.f32 0.0, %v891_v9  ;;  %v947_v16 = vsub.f32 0.0, %v946_v11  ;;  %v950_v17 = vsub.f32 0.0, %v1780_v53  ;;  %v1011_v14 = vsub.f32 0.0, %v1010_v12 }
  0x7e   :  { %v774_v52 = vsub.f32 %v770_v38, %v772_v46  ;;  %v775_v54 = vsub.f32 %v771_v41, %v773_v47  ;;  %v780_v62 = vadd.f32 %v778_v48, %v776_v42  ;;  %v781_v21 = vadd.f32 %v779_v50, %v777_v44 }
  0x7f   :  { %v887_v18 = vrot.slane %v1760_v23, %v1731_v10  ;;  %v894_v19 = vsel %vm19_vm8, %v892_v0, %v891_v9  ;;  %v896_v24 = vsel %vm18_vm14, %v895_v15, %v1775_v30  ;;  %v893_v31 = vsel %vm18_vm14, %v892_v0, %v891_v9 }
  0x80   :  { %v1418_v58 = vpack.c.bf16 %v775_v54, %v774_v52  ;;  %v1422_v61 = vpack.c.bf16 %v781_v21, %v780_v62  ;;  %v897_v32 = vsel %vm19_vm8, %v895_v15, %v1775_v30  ;;  %v1884_v56 = vrot.slane %v1760_v23, %v1734_v13 }
  0x81   :  { %v948_v10 = vsel %vm24_vm13, %v947_v16, %v946_v11  ;;  %v1890_v27 = vsel %vm25_vm9, %v947_v16, %v946_v11  ;;  %v1896_v2 = vsel %vm24_vm13, %v950_v17, %v1780_v53  ;;  %v1901_v63 = vsel %vm25_vm9, %v950_v17, %v1780_v53 }
  0x82   :  { %1419 = vmatprep.subr.bf16.mxu0 %v1418_v58  ;;  %v1905_v13 = vsel %vm30_vm5, %v1011_v14, %v1010_v12  ;;  %v1014_v50 = vsub.f32 0.0, %v1807_v39  ;;  %v1914_v15 = vrot.slane %v1760_v23, %v1740_v34  ;;  %v1918_v16 = vsel %vm31_vm10, %v1011_v14, %v1010_v12 }
  0x83   :  { %1421 = vmatpush3.bf16.msra.mxu0 %v1418_v58  ;;  %vm983_vm14 = vcmp.lt.s32.totalorder %v1677_v43, 6 }
  0x84   :  { %1423 = vmatprep.subr.bf16.mxu0 %v1422_v61 }
  0x87   :  { %1425 = vmatpush3.bf16.msra.mxu0 %v1422_v61 }
  0x8a   :  { %1388 = vmatmul.mubr.msk.f32.vlgmr.msra.gmra.mrb[0].mxu0 %vm786_vm12, %v783_v25 }
  0x8b   :  { %1390 = vmatprep.mubr.msk.f32.mxu0 %vm786_vm12, %v784_v1 }
  0x8e   :  { %1391 = vmatmul.mubr.msk.f32.gmra.mrb[2].mxu0 %vm786_vm12, %v785_v3 }
 0x15d   :  { %v1389_v59 = vpop.f32.mrb[0].mxu0 }
 0x15e   :  { %v865_v6 = vpop.f32.mrb[1].mxu0  ;;  %v899_v49 = vmul.f32 %v1389_v59, %v1763_v26  ;;  %v915_v30 = vmul.f32 %v1389_v59, %v894_v19  ;;  %v904_v52 = vmul.f32 %v1389_v59, %v896_v24  ;;  %v922_v3 = vmul.f32 %v1389_v59, %v887_v18 }
 0x15f   :  { %v898_v36 = vmul.f32 %v865_v6, %v1763_v26  ;;  %v914_v41 = vmul.f32 %v893_v31, %v865_v6  ;;  %v905_v53 = vmul.f32 %v897_v32, %v865_v6  ;;  %v923_v58 = vmul.f32 %v887_v18, %v865_v6 }
 0x160   :  { %v1923_v6 = vsel %vm30_vm5, %v1014_v50, %v1807_v39  ;;  %v1074_v59 = vrot.slane %v1728_v5, %v1750_v4 }
 0x161   :  { %v1392_v35 = vpop.f32.mrb[2].mxu0 }
 0x162   :  { %v901_v29 = vmul.f32 %v1392_v35, %v894_v19  ;;  %v913_v37 = vmul.f32 %v1392_v35, %v1763_v26  ;;  %v875_v38 = vpop.f32.mrb[3].mxu0  ;;  %v918_v54 = vmul.f32 %v1392_v35, %v896_v24  ;;  %v908_v60 = vmul.f32 %v1392_v35, %v887_v18 }
 0x163   :  { %v900_v42 = vmul.f32 %v893_v31, %v875_v38  ;;  %v912_v44 = vmul.f32 %v875_v38, %v1763_v26  ;;  %v919_v46 = vmul.f32 %v897_v32, %v875_v38  ;;  %v909_v25 = vmul.f32 %v887_v18, %v875_v38 }
 0x164   :  { %v903_v47 = vsub.f32 %v899_v49, %v901_v29  ;;  %v917_v48 = vadd.f32 %v915_v30, %v913_v37 }
 0x165   :  { %v902_v62 = vsub.f32 %v898_v36, %v900_v42  ;;  %v916_v21 = vadd.f32 %v914_v41, %v912_v44 }
 0x166   :  { %v907_v61 = vadd.f32 %v905_v53, %v903_v47  ;;  %v921_v1 = vadd.f32 %v919_v46, %v917_v48  ;;  %v1075_v48 = vsub.f32 0.0, %v1074_v59 }
 0x167   :  { %v906_v9 = vadd.f32 %v904_v52, %v902_v62  ;;  %v920_v11 = vadd.f32 %v918_v54, %v916_v21 }
 0x168   :  { %v911_v0 = vadd.f32 %v909_v25, %v907_v61  ;;  %v925_v26 = vsub.f32 %v921_v1, %v923_v58 }
 0x169   :  { %v910_v17 = vadd.f32 %v908_v60, %v906_v9  ;;  %v924_v19 = vsub.f32 %v920_v11, %v922_v3  ;;  %v1016_v60 = vsel %vm31_vm10, %v1014_v50, %v1807_v39 }
 0x16a   :  { %v927_v18 = vrot.slane %v911_v0, 4  ;;  %v934_v24 = vrot.slane %v925_v26, 4  ;;  %v954_v31 = vmul.f32 %v911_v0, %v1766_v8  ;;  %v956_v34 = vmul.f32 %v1890_v27, %v925_v26 }
 0x16b   :  { %v926_v32 = vrot.slane %v910_v17, 4  ;;  %v933_v49 = vrot.slane %v924_v19, 4  ;;  %v953_v12 = vmul.f32 %v910_v17, %v1766_v8  ;;  %v955_v14 = vmul.f32 %v948_v10, %v924_v19 }
 0x16c   :  { %v958_v35 = vsub.f32 %v954_v31, %v956_v34  ;;  %v967_v30 = vmul.f32 %v924_v19, %v1766_v8  ;;  %v968_v36 = vmul.f32 %v925_v26, %v1766_v8  ;;  %v969_v29 = vmul.f32 %v948_v10, %v910_v17 }
 0x16d   :  { %v929_v5 = vsel %vm928_vm11, %v926_v32, %v927_v18  ;;  %v930_v37 = vsel %vm928_vm11, %v927_v18, %v926_v32  ;;  %v935_v38 = vsel %vm928_vm11, %v933_v49, %v934_v24  ;;  %v936_v41 = vsel %vm928_vm11, %v934_v24, %v933_v49 }
 0x16e   :  { %v931_v8 = vsel %vm24_vm13, %v929_v5, %v930_v37  ;;  %v932_v10 = vsel %vm25_vm9, %v930_v37, %v929_v5  ;;  %v937_v42 = vsel %vm24_vm13, %v935_v38, %v936_v41  ;;  %v938_v44 = vsel %vm25_vm9, %v936_v41, %v935_v38 }
 0x16f   :  { %v957_v46 = vsub.f32 %v953_v12, %v955_v14  ;;  %v959_v53 = vmul.f32 %v1896_v2, %v931_v8  ;;  %v960_v47 = vmul.f32 %v1901_v63, %v932_v10  ;;  %v963_v52 = vmul.f32 %v1884_v56, %v937_v42 }
 0x170   :  { %v970_v54 = vmul.f32 %v1890_v27, %v911_v0  ;;  %v971_v62 = vadd.f32 %v969_v29, %v967_v30  ;;  %v973_v21 = vmul.f32 %v1896_v2, %v937_v42  ;;  %v964_v45 = vmul.f32 %v1884_v56, %v938_v44 }
 0x171   :  { %v961_v58 = vadd.f32 %v959_v53, %v957_v46  ;;  %v962_v61 = vadd.f32 %v960_v47, %v958_v35  ;;  %v974_v55 = vmul.f32 %v1901_v63, %v938_v44  ;;  %v977_v3 = vmul.f32 %v1884_v56, %v931_v8 }
 0x172   :  { %v972_v25 = vadd.f32 %v970_v54, %v968_v36  ;;  %v975_v1 = vadd.f32 %v973_v21, %v971_v62  ;;  %v1963_v27 = vsel %vm1752_vm6, %v1075_v48, %v1074_v59  ;;  %v1967_v2 = vsel %vm1756_vm7, %v1075_v48, %v1074_v59 }
 0x173   :  { %v965_v9 = vadd.f32 %v963_v52, %v961_v58  ;;  %v966_v11 = vadd.f32 %v964_v45, %v962_v61  ;;  %v978_v63 = vmul.f32 %v1884_v56, %v932_v10  ;;  %v1078_v17 = vsub.f32 0.0, %v1810_v40 }
 0x174   :  { %v976_v0 = vadd.f32 %v974_v55, %v972_v25  ;;  %v979_v26 = vsub.f32 %v975_v1, %v977_v3  ;;  %v2006_v62 = vrot.slane %v1760_v23, %v1750_v4  ;;  %vm1237_vm13 = vcmask 1042432  }
 0x175   :  { %v982_v19 = vrot.slane %v966_v11, 2  ;;  %v987_v18 = vrot.slane %v966_v11, 6  ;;  %v981_v24 = vrot.slane %v965_v9, 2  ;;  %v986_v39 = vrot.slane %v965_v9, 6 }
 0x176   :  { %v980_v50 = vsub.f32 %v976_v0, %v978_v63  ;;  %v993_v31 = vrot.slane %v979_v26, 2  ;;  %v997_v34 = vrot.slane %v979_v26, 6  ;;  %v1017_v32 = vmul.f32 %v965_v9, %v1772_v28 }
 0x177   :  { %v984_v49 = vsel %vm983_vm14, %v981_v24, %v982_v19  ;;  %v985_v59 = vsel %vm983_vm14, %v982_v19, %v981_v24  ;;  %v989_v56 = vsel %vm988_vm15, %v986_v39, %v987_v18  ;;  %v990_v12 = vsel %vm988_vm15, %v987_v18, %v986_v39 }
 0x178   :  { %v994_v14 = vrot.slane %v980_v50, 2  ;;  %v998_v35 = vrot.slane %v980_v50, 6  ;;  %v991_v30 = vsel %vm30_vm5, %v984_v49, %v990_v12  ;;  %v992_v36 = vsel %vm31_vm10, %v985_v59, %v989_v56 }
 0x179   :  { %v1018_v29 = vmul.f32 %v966_v11, %v1772_v28  ;;  %v1019_v5 = vmul.f32 %v1905_v13, %v979_v26  ;;  %v1020_v37 = vmul.f32 %v1918_v16, %v980_v50  ;;  %v1023_v38 = vmul.f32 %v1923_v6, %v991_v30 }
 0x17a   :  { %v995_v41 = vsel %vm983_vm14, %v993_v31, %v994_v14  ;;  %v996_v8 = vsel %vm983_vm14, %v994_v14, %v993_v31  ;;  %v999_v10 = vsel %vm988_vm15, %v997_v34, %v998_v35  ;;  %v1000_v42 = vsel %vm988_vm15, %v998_v35, %v997_v34 }
 0x17b   :  { %v1001_v44 = vsel %vm30_vm5, %v995_v41, %v1000_v42  ;;  %v1002_v46 = vsel %vm31_vm10, %v996_v8, %v999_v10  ;;  %v1021_v53 = vsub.f32 %v1017_v32, %v1019_v5  ;;  %v1022_v47 = vsub.f32 %v1018_v29, %v1020_v37 }
 0x17c   :  { %v1024_v48 = vmul.f32 %v1016_v60, %v992_v36  ;;  %v1027_v52 = vmul.f32 %v1914_v15, %v1001_v44  ;;  %v1031_v54 = vmul.f32 %v979_v26, %v1772_v28  ;;  %v1032_v58 = vmul.f32 %v980_v50, %v1772_v28 }
 0x17d   :  { %v1025_v21 = vadd.f32 %v1023_v38, %v1021_v53  ;;  %v1033_v7 = vmul.f32 %v1905_v13, %v965_v9  ;;  %v1034_v61 = vmul.f32 %v1918_v16, %v966_v11  ;;  %v1028_v45 = vmul.f32 %v1914_v15, %v1002_v46 }
 0x17e   :  { %v1026_v51 = vadd.f32 %v1024_v48, %v1022_v47  ;;  %v1037_v55 = vmul.f32 %v1923_v6, %v1001_v44  ;;  %v1038_v25 = vmul.f32 %v1016_v60, %v1002_v46  ;;  %v1079_v4 = vsel %vm1752_vm6, %v1078_v17, %v1810_v40 }
 0x17f   :  { %v1029_v1 = vadd.f32 %v1027_v52, %v1025_v21  ;;  %v1035_v3 = vadd.f32 %v1033_v7, %v1031_v54  ;;  %v1036_v0 = vadd.f32 %v1034_v61, %v1032_v58  ;;  %v1041_v28 = vmul.f32 %v1914_v15, %v991_v30 }
 0x180   :  { %v1030_v23 = vadd.f32 %v1028_v45, %v1026_v51  ;;  %v1042_v13 = vmul.f32 %v1914_v15, %v992_v36  ;;  %v1080_v16 = vsel %vm1756_vm7, %v1078_v17, %v1810_v40 }
 0x181   :  { %v1039_v9 = vadd.f32 %v1037_v55, %v1035_v3  ;;  %v1040_v11 = vadd.f32 %v1038_v25, %v1036_v0  ;;  %v1045_v6 = vrot.slane %v1029_v1, 1  ;;  %v1050_v60 = vrot.slane %v1029_v1, 7  ;;  %v1351_v3 = vld [vmem:[%s2075_s1 + $0x30] sm:$0xff] }
 0x182   :  { %v1046_v63 = vrot.slane %v1030_v23, 1  ;;  %v1051_v26 = vrot.slane %v1030_v23, 7  ;;  %v1081_v19 = vmul.f32 %v1029_v1, %v1785_v33  ;;  %v1082_v18 = vmul.f32 %v1030_v23, %v1785_v33 }
 0x183   :  { %v1043_v24 = vsub.f32 %v1039_v9, %v1041_v28  ;;  %v1044_v39 = vsub.f32 %v1040_v11, %v1042_v13  ;;  %v1097_v50 = vmul.f32 %v1963_v27, %v1029_v1  ;;  %v1098_v15 = vmul.f32 %v1967_v2, %v1030_v23  ;;  %v1350_v1 = vld [vmem:[%s2075_s1 + $0x28] sm:$0xff] }
 0x184   :  { %v1048_v31 = vsel %vm1047_vm0, %v1045_v6, %v1046_v63  ;;  %v1049_v40 = vsel %vm1047_vm0, %v1046_v63, %v1045_v6  ;;  %v1053_v17 = vsel %vm1052_vm1, %v1050_v60, %v1051_v26  ;;  %v1054_v34 = vsel %vm1052_vm1, %v1051_v26, %v1050_v60 }
 0x185   :  { %v1055_v32 = vsel %vm1752_vm6, %v1048_v31, %v1054_v34  ;;  %v1056_v49 = vsel %vm1756_vm7, %v1049_v40, %v1053_v17  ;;  %v1057_v59 = vrot.slane %v1043_v24, 1  ;;  %v1058_v56 = vrot.slane %v1044_v39, 1 }
 0x186   :  { %v1061_v12 = vrot.slane %v1043_v24, 7  ;;  %v1062_v14 = vrot.slane %v1044_v39, 7  ;;  %v1083_v35 = vmul.f32 %v1963_v27, %v1043_v24  ;;  %v1084_v30 = vmul.f32 %v1967_v2, %v1044_v39 }
 0x187   :  { %v1059_v36 = vsel %vm1047_vm0, %v1057_v59, %v1058_v56  ;;  %v1060_v29 = vsel %vm1047_vm0, %v1058_v56, %v1057_v59  ;;  %v1087_v5 = vmul.f32 %v1079_v4, %v1055_v32  ;;  %v1088_v37 = vmul.f32 %v1080_v16, %v1056_v49 }
 0x188   :  { %v1063_v38 = vsel %vm1052_vm1, %v1061_v12, %v1062_v14  ;;  %v1064_v41 = vsel %vm1052_vm1, %v1062_v14, %v1061_v12  ;;  %v1085_v8 = vsub.f32 %v1081_v19, %v1083_v35  ;;  %v1086_v10 = vsub.f32 %v1082_v18, %v1084_v30 }
 0x189   :  { %v1065_v27 = vsel %vm1752_vm6, %v1059_v36, %v1064_v41  ;;  %v1066_v2 = vsel %vm1756_vm7, %v1060_v29, %v1063_v38  ;;  %v1095_v42 = vmul.f32 %v1043_v24, %v1785_v33  ;;  %v1096_v44 = vmul.f32 %v1044_v39, %v1785_v33 }
 0x18a   :  { %v1089_v46 = vadd.f32 %v1087_v5, %v1085_v8  ;;  %v1090_v53 = vadd.f32 %v1088_v37, %v1086_v10  ;;  %v1091_v47 = vmul.f32 %v2006_v62, %v1065_v27  ;;  %v1092_v48 = vmul.f32 %v2006_v62, %v1066_v2 }
 0x18b   :  { %v1101_v43 = vmul.f32 %v1079_v4, %v1065_v27  ;;  %v1102_v52 = vmul.f32 %v1080_v16, %v1066_v2  ;;  %v1099_v54 = vadd.f32 %v1097_v50, %v1095_v42  ;;  %v1100_v21 = vadd.f32 %v1098_v15, %v1096_v44 }
 0x18c   :  { %v1093_v58 = vadd.f32 %v1091_v47, %v1089_v46  ;;  %v1094_v20 = vadd.f32 %v1092_v48, %v1090_v53  ;;  %v1105_v22 = vmul.f32 %v2006_v62, %v1055_v32  ;;  %v1106_v51 = vmul.f32 %v2006_v62, %v1056_v49  ;;  %v1352_v62 = vld [vmem:[%s2075_s1 + $0x38] sm:$0xff] }
 0x18d   :  { %v1103_v7 = vadd.f32 %v1101_v43, %v1099_v54  ;;  %v1104_v61 = vadd.f32 %v1102_v52, %v1100_v21  ;;  %v1479_v0 = vmov 0.0|0.0   ;;  %v1481_v4 = vmov 0.0  }
 0x18e   :  { %v1426_v45 = vpack.c.bf16 %v1094_v20, %v1093_v58  ;;  %1434 = vmatprep.subr.bf16.mxu0 %v1479_v0  ;;  %1415 = vmatprep.mubr.msk.f32.mxu0 %vm1480_vm2, %v1481_v4  ;;  %v1212_v23 = vand.u32 127, %v11_v57 }
 0x18f   :  { %v1107_v33 = vsub.f32 %v1103_v7, %v1105_v22  ;;  %v1108_v55 = vsub.f32 %v1104_v61, %v1106_v51 }
 0x190   :  { %1427 = vmatprep.subr.bf16.mxu1 %v1426_v45  ;;  %v1213_v28 = vand.u32 15, %v1212_v23 }
 0x191   :  { %1429 = vmatpush3.bf16.msra.mxu1 %v1426_v45  ;;  %v1430_v25 = vpack.c.bf16 %v1108_v55, %v1107_v33 }
 0x192   :  { %v1214_v13 = vshra.s32 %v1213_v28, 3  ;;  %v1219_v16 = vshra.s32 %v1213_v28, 2  ;;  %v1224_v9 = vshra.s32 %v1213_v28, 1  ;;  %v1229_v19 = vand.u32 1, %v1213_v28 }
 0x193   :  { %1431 = vmatprep.subr.bf16.mxu1 %v1430_v25 }
 0x194   :  { %v1215_v11 = vand.u32 1, %v1214_v13  ;;  %v1220_v6 = vand.u32 1, %v1219_v16  ;;  %v1225_v60 = vand.u32 1, %v1224_v9  ;;  %v1230_v50 = vmul.u32 2, %v1229_v19 }
 0x195   :  { %1433 = vmatpush3.bf16.msra.mxu1 %v1430_v25 }
 0x196   :  { %v1216_v63 = vmul.u32 2, %v1215_v11  ;;  %v1221_v26 = vmul.u32 2, %v1220_v6  ;;  %v1231_v49 = vsub.s32 1, %v1230_v50 }
 0x197   :  { %v1226_v18 = vmul.u32 2, %v1225_v60 }
 0x198   :  { %1402 = vmatmul.mubr.msk.f32.vlgmr.msra.gmra.mrb[0].mxu1 %vm786_vm12, %v1350_v1  ;;  %v1217_v24 = vsub.s32 1, %v1216_v63  ;;  %v1222_v39 = vsub.s32 1, %v1221_v26  ;;  %v1232_v29 = vcvt.s32.f32 %v1231_v49 }
 0x199   :  { %1404 = vmatprep.mubr.msk.f32.mxu1 %vm786_vm12, %v1351_v3  ;;  %v1227_v15 = vsub.s32 1, %v1226_v18 }
 0x19a   :  { %v1218_v40 = vcvt.s32.f32 %v1217_v24  ;;  %v1223_v17 = vcvt.s32.f32 %v1222_v39 }
 0x19b   :  { %v1228_v59 = vcvt.s32.f32 %v1227_v15 }
 0x19c   :  { %1405 = vmatmul.mubr.msk.f32.gmra.mrb[2].mxu1 %vm786_vm12, %v1352_v62  ;;  %v1234_v14 = vsel %vm1233_vm3, %v1218_v40, %v1223_v17 }
 0x19d   :  { %v1236_v5 = vsel %vm1235_vm4, %v1234_v14, %v1228_v59 }
 0x19e   :  { %v1238_v38 = vsel %vm1237_vm13, %v1236_v5, %v1232_v29 }
 0x26b   :  { %v1403_v31 = vpop.f32.mrb[0].mxu1 }
 0x26c   :  { %v1240_v34 = vmul.f32 %v1403_v31, %v1403_v31  ;;  %v1192_v57 = vpop.f32.mrb[1].mxu1 }
 0x26d   :  { %v1239_v32 = vmul.f32 %v1192_v57, %v1192_v57 }
 0x26f   :  { %v1435_v56 = vpack.c.bf16 %v1240_v34, %v1239_v32  ;;  %v1406_v12 = vpop.f32.mrb[2].mxu1 }
 0x270   :  { %v1242_v35 = vmul.f32 %v1406_v12, %v1406_v12  ;;  %v1202_v30 = vpop.f32.mrb[3].mxu1 }
 0x271   :  { %v1241_v36 = vmul.f32 %v1202_v30, %v1202_v30  ;;  %1436 = vmatpush3.bf16.msra.mxu0 %v1435_v56 }
 0x272   :  { %1437 = vmatprep.subr.bf16.mxu0 %v1479_v0 }
 0x273   :  { %v1438_v37 = vpack.c.bf16 %v1242_v35, %v1241_v36 }
 0x275   :  { %1439 = vmatpush3.bf16.msra.mxu0 %v1438_v37 }
 0x278   :  { %1416 = vmatmul.mubr.msk.f32.vlgmr.msra.gmra.mrb[4].mxu0 %vm786_vm12, %v1238_v38 }
 0x34b   :  { %v1312_v41 = vpop.f32.mrb[4].mxu0 }
 0x34c   :  { %1316 = vst [vmem:[%s2076_s2] sm:$0xf] %v1312_v41  ;;  %v1417_v8 = vpop.f32.mrb[5].mxu0 }

</bundles_post_ra>
